<compile_context>
chip_gen: v6e
topology: v6e:2x2x1
jax: 0.10.0
libtpu: 0.0.40
codegen_flags: <defaults>
</compile_context>

<pallas_src>
import functools
import math

import jax
import jax.numpy as jnp
from jax import lax
from jax.experimental import pallas as pl
from jax.experimental.pallas import tpu as pltpu


_VMEM_LIMIT_BYTES = 48 * 1024 * 1024        # headroom below v7x 64 MiB physical
_ROW_TILES = (256, 128, 64, 32, 16, 8)
_HEAD_ROW_TILES = (512,) + _ROW_TILES
_COL_TILES = (512, 256, 128)
_SEQ_TILES = (128, 64, 32, 16, 8)
_VOCAB_PAD = 512                             # pad V so a 512-wide vocab tile divides


def _pick_tile(n, candidates):
    """Largest candidate dividing n, else the full dim (always a legal block)."""
    for c in candidates:
        if n % c == 0:
            return c
    return n


# ----------------------------- in-kernel helpers -----------------------------

def _layernorm(x, w, b, eps=1e-5):
    # x: (R, C) f32, w/b: (1, C) f32 -- statistics kept in f32.
    mu = jnp.mean(x, axis=-1, keepdims=True)
    var = jnp.mean((x - mu) ** 2, axis=-1, keepdims=True)
    return (x - mu) * lax.rsqrt(var + eps) * w + b


def _gelu_tanh(x):
    # GELU(approximate='tanh'), f32 elementwise math.
    c = 0.7978845608028654  # sqrt(2/pi)
    return 0.5 * x * (1.0 + jnp.tanh(c * (x + 0.044715 * x * x * x)))


# ----------------------------- Pallas kernels --------------------------------

def ln_linear_kernel(x_ref, lnw_ref, lnb_ref, w_ref, b_ref, o_ref, *, apply_gelu):
    # Fused LayerNorm + Linear (+ optional tanh-GELU).
    # Grid: (row tiles [parallel], output-column tiles [parallel]).
    h = _layernorm(x_ref[...], lnw_ref[...], lnb_ref[...])
    y = jnp.dot(h.astype(w_ref.dtype), w_ref[...],
                preferred_element_type=jnp.float32) + b_ref[...]
    if apply_gelu:
        y = _gelu_tanh(y)
    o_ref[...] = y.astype(o_ref.dtype)


def matmul_residual_kernel(a_ref, w_ref, b_ref, res_ref, o_ref):
    # y = residual + (a @ w + b); the residual stream is aliased in place.
    y = jnp.dot(a_ref[...], w_ref[...],
                preferred_element_type=jnp.float32) + b_ref[...]
    o_ref[...] = res_ref[...] + y


def flash_attn_kernel(q_ref, k_ref, v_ref, o_ref, acc_sc, m_sc, l_sc,
                      *, n_head, t_tile):
    # Causal flash attention, grid = (B [parallel], q tiles [parallel],
    # kv tiles [arbitrary]); online softmax state lives in VMEM scratch.
    i = pl.program_id(1)
    j = pl.program_id(2)
    nkv = pl.num_programs(2)

    @pl.when(j == 0)
    def _():
        acc_sc[...] = jnp.zeros(acc_sc.shape, jnp.float32)
        m_sc[...] = jnp.full(m_sc.shape, -1e30, jnp.float32)
        l_sc[...] = jnp.zeros(l_sc.shape, jnp.float32)

    # Causal skip: with tq == tkv, kv tile j only contributes when j <= i.
    @pl.when(j <= i)
    def _():
        tq, C = q_ref.shape
        H = n_head
        hd = C // H
        q = q_ref[...].reshape(tq, H, hd)     # bf16; attention scale pre-folded
        k = k_ref[...].reshape(tq, H, hd)
        v = v_ref[...].reshape(tq, H, hd)

        s = jnp.einsum('qhd,khd->hqk', q, k,
                       preferred_element_type=jnp.float32)        # (H, tq, tkv)

        row = lax.broadcasted_iota(jnp.int32, (tq, tq), 0) + i * t_tile
        col = lax.broadcasted_iota(jnp.int32, (tq, tq), 1) + j * t_tile
        s = jnp.where((col <= row)[None, :, :], s, jnp.float32(-1e30))

        m_prev = m_sc[...]
        m_new = jnp.maximum(m_prev, jnp.max(s, axis=-1, keepdims=True))
        alpha = jnp.exp(m_prev - m_new)
        p = jnp.exp(s - m_new)
        l_sc[...] = alpha * l_sc[...] + jnp.sum(p, axis=-1, keepdims=True)
        acc_sc[...] = alpha * acc_sc[...] + jnp.einsum(
            'hqk,khd->hqd', p.astype(v.dtype), v,
            preferred_element_type=jnp.float32)                   # (H, tq, hd)
        m_sc[...] = m_new

    @pl.when(j == nkv - 1)
    def _():
        tq, C = q_ref.shape
        out = acc_sc[...] * pl.reciprocal(l_sc[...], approx=True)  # (H, tq, hd)
        out = jnp.swapaxes(out, 0, 1).reshape(tq, C)               # (tq, C)
        o_ref[...] = out.astype(o_ref.dtype)


def head_loss_kernel(x_ref, lnw_ref, lnb_ref, w_ref, tgt_ref,
                     logits_ref, loss_ref,
                     h_sc, m_sc, l_sc, t_sc, *, v_tile, v_valid):
    # Fused final LayerNorm + lm_head + per-row cross-entropy (online logsumexp).
    # Grid: (row tiles [parallel], vocab tiles [arbitrary / reduction]).
    j = pl.program_id(1)
    nv = pl.num_programs(1)

    @pl.when(j == 0)
    def _():
        h_sc[...] = _layernorm(x_ref[...], lnw_ref[...], lnb_ref[...])
        m_sc[...] = jnp.full(m_sc.shape, -1e30, jnp.float32)
        l_sc[...] = jnp.zeros(l_sc.shape, jnp.float32)
        t_sc[...] = jnp.zeros(t_sc.shape, jnp.float32)

    w = w_ref[...]                                    # (C, tv) bf16 (wte^T tile)
    h = h_sc[...].astype(w.dtype)                     # (tr, C)
    lg = jnp.dot(h, w, preferred_element_type=jnp.float32)          # (tr, tv)

    # mask vocab padding columns (col >= true vocab size)
    col = lax.broadcasted_iota(jnp.int32, lg.shape, 1) + j * v_tile
    lg = jnp.where(col < v_valid, lg, jnp.float32(-1e30))
    logits_ref[...] = lg.astype(logits_ref.dtype)     # bf16 logits (half the HBM write)

    # online logsumexp over the vocab tiles
    m_prev = m_sc[...]
    m_new = jnp.maximum(m_prev, jnp.max(lg, axis=-1, keepdims=True))
    alpha = jnp.exp(m_prev - m_new)
    l_sc[...] = alpha * l_sc[...] + jnp.sum(jnp.exp(lg - m_new),
                                            axis=-1, keepdims=True)
    m_sc[...] = m_new

    # accumulate the target logit (never matches padded or negative targets)
    t_sc[...] += jnp.sum(jnp.where(col == tgt_ref[...], lg, 0.0),
                         axis=-1, keepdims=True)

    @pl.when(j == nv - 1)
    def _():
        loss_ref[...] = (m_sc[...] + jnp.log(l_sc[...])) - t_sc[...]


# ----------------------------- pallas_call wrappers ---------------------------

def run_ln_linear(x, lnw, lnb, w, b, *, apply_gelu):
    N, C = x.shape
    Nout = w.shape[1]
    tr = _pick_tile(N, _ROW_TILES)
    tn = _pick_tile(Nout, _COL_TILES)
    return pl.pallas_call(
        functools.partial(ln_linear_kernel, apply_gelu=apply_gelu),
        out_shape=jax.ShapeDtypeStruct((N, Nout), jnp.bfloat16),
        grid=(N // tr, Nout // tn),
        in_specs=[
            pl.BlockSpec((tr, C), lambda i, j: (i, 0)),
            pl.BlockSpec((1, C), lambda i, j: (0, 0)),
            pl.BlockSpec((1, C), lambda i, j: (0, 0)),
            pl.BlockSpec((C, tn), lambda i, j: (0, j)),    # weight tiled over N
            pl.BlockSpec((1, tn), lambda i, j: (0, j)),
        ],
        out_specs=pl.BlockSpec((tr, tn), lambda i, j: (i, j)),
        compiler_params=pltpu.CompilerParams(
            dimension_semantics=("parallel", "parallel"),
            vmem_limit_bytes=_VMEM_LIMIT_BYTES),
    )(x, lnw, lnb, w, b)


def run_matmul_residual(a, w, b, res):
    N, K = a.shape
    Nout = w.shape[1]
    tr = _pick_tile(N, _ROW_TILES)
    tn = _pick_tile(Nout, _COL_TILES)
    return pl.pallas_call(
        matmul_residual_kernel,
        out_shape=jax.ShapeDtypeStruct((N, Nout), jnp.float32),
        grid=(N // tr, Nout // tn),
        in_specs=[
            pl.BlockSpec((tr, K), lambda i, j: (i, 0)),
            pl.BlockSpec((K, tn), lambda i, j: (0, j)),
            pl.BlockSpec((1, tn), lambda i, j: (0, j)),
            pl.BlockSpec((tr, tn), lambda i, j: (i, j)),
        ],
        out_specs=pl.BlockSpec((tr, tn), lambda i, j: (i, j)),
        input_output_aliases={3: 0},   # residual stream updated in place in HBM
        compiler_params=pltpu.CompilerParams(
            dimension_semantics=("parallel", "parallel"),
            vmem_limit_bytes=_VMEM_LIMIT_BYTES),
    )(a, w, b, res)


def run_flash_attention(q, k, v, n_head):
    B, T, C = q.shape
    hd = C // n_head
    t = _pick_tile(T, _SEQ_TILES)
    nT = T // t
    return pl.pallas_call(
        functools.partial(flash_attn_kernel, n_head=n_head, t_tile=t),
        out_shape=jax.ShapeDtypeStruct((B, T, C), jnp.bfloat16),
        grid=(B, nT, nT),
        in_specs=[
            pl.BlockSpec((None, t, C), lambda b, i, j: (b, i, 0)),   # q
            pl.BlockSpec((None, t, C), lambda b, i, j: (b, j, 0)),   # k
            pl.BlockSpec((None, t, C), lambda b, i, j: (b, j, 0)),   # v
        ],
        out_specs=pl.BlockSpec((None, t, C), lambda b, i, j: (b, i, 0)),
        scratch_shapes=[
            pltpu.VMEM((n_head, t, hd), jnp.float32),   # output accumulator
            pltpu.VMEM((n_head, t, 1), jnp.float32),    # running max
            pltpu.VMEM((n_head, t, 1), jnp.float32),    # running sum-exp
        ],
        compiler_params=pltpu.CompilerParams(
            dimension_semantics=("parallel", "parallel", "arbitrary"),
            vmem_limit_bytes=_VMEM_LIMIT_BYTES),
    )(q, k, v)


def run_head_and_loss(x2d, lnw, lnb, wte_t, targets, vocab_size):
    N, C = x2d.shape
    V_pad = wte_t.shape[1]
    tg = targets.reshape(N, 1).astype(jnp.int32)

    tr = _pick_tile(N, _HEAD_ROW_TILES)      # large row tiles: fewer wte re-streams
    tv = _pick_tile(V_pad, _COL_TILES)       # lane-dense vocab tiles (V_pad % 512 == 0)

    logits, row_loss = pl.pallas_call(
        functools.partial(head_loss_kernel, v_tile=tv, v_valid=vocab_size),
        out_shape=(jax.ShapeDtypeStruct((N, V_pad), jnp.bfloat16),
                   jax.ShapeDtypeStruct((N, 1), jnp.float32)),
        grid=(N // tr, V_pad // tv),
        in_specs=[
            pl.BlockSpec((tr, C), lambda i, j: (i, 0)),    # x rows
            pl.BlockSpec((1, C), lambda i, j: (0, 0)),     # ln_f w
            pl.BlockSpec((1, C), lambda i, j: (0, 0)),     # ln_f b
            pl.BlockSpec((C, tv), lambda i, j: (0, j)),    # wte^T vocab tile (bf16)
            pl.BlockSpec((tr, 1), lambda i, j: (i, 0)),    # targets
        ],
        out_specs=(pl.BlockSpec((tr, tv), lambda i, j: (i, j)),   # bf16 logits tile
                   pl.BlockSpec((tr, 1), lambda i, j: (i, 0))),   # per-row loss
        scratch_shapes=[pltpu.VMEM((tr, C), jnp.float32),   # normalized rows
                        pltpu.VMEM((tr, 1), jnp.float32),   # running max
                        pltpu.VMEM((tr, 1), jnp.float32),   # running sum-exp
                        pltpu.VMEM((tr, 1), jnp.float32)],  # target logit
        compiler_params=pltpu.CompilerParams(
            dimension_semantics=("parallel", "arbitrary"),
            vmem_limit_bytes=_VMEM_LIMIT_BYTES),
    )(x2d, lnw, lnb, wte_t, tg)
    return logits, row_loss


# ----------------------------- parameter init ---------------------------------

def init_params(key, *, vocab_size, block_size, n_layer, n_head, n_embd):
    std = 0.02
    proj_std = 0.02 * (2 * n_layer) ** (-0.5)  # only attn.c_proj has the scale flag
    hd = n_embd // n_head
    attn_scale = 1.0 / math.sqrt(hd)
    keys = iter(jax.random.split(key, 2 + 4 * n_layer))

    def nrm(shape, s):
        return s * jax.random.normal(next(keys), shape, jnp.float32)

    wte = nrm((vocab_size, n_embd), std)
    v_pad = ((vocab_size + _VOCAB_PAD - 1) // _VOCAB_PAD) * _VOCAB_PAD
    # Pre-transposed, vocab-padded copy of the tied wte for the lm_head path
    # (avoids any per-tile transpose in the head kernel; padded cols are zero
    # and masked to -1e30 inside the kernel).
    wte_t = jnp.zeros((n_embd, v_pad), jnp.float32).at[:, :vocab_size].set(wte.T)

    params = {
        'wte': wte.astype(jnp.bfloat16),
        'wte_t': wte_t.astype(jnp.bfloat16),
        'wpe': nrm((block_size, n_embd), std),            # f32
        'ln_f_w': jnp.ones((1, n_embd), jnp.float32),
        'ln_f_b': jnp.zeros((1, n_embd), jnp.float32),
        'blocks': [],
    }
    for _ in range(n_layer):
        w_qkv = nrm((n_embd, 3 * n_embd), std)
        # Fold the 1/sqrt(head_dim) attention scale into the q columns (free at
        # runtime).  A nonzero q bias would need the same fold.
        w_qkv = w_qkv.at[:, :n_embd].multiply(attn_scale)
        blk = {
            'ln1_w': jnp.ones((1, n_embd), jnp.float32),
            'ln1_b': jnp.zeros((1, n_embd), jnp.float32),
            'w_qkv': w_qkv.astype(jnp.bfloat16),
            'b_qkv': jnp.zeros((1, 3 * n_embd), jnp.float32),
            'w_attn_proj': nrm((n_embd, n_embd), proj_std).astype(jnp.bfloat16),
            'b_attn_proj': jnp.zeros((1, n_embd), jnp.float32),
            'ln2_w': jnp.ones((1, n_embd), jnp.float32),
            'ln2_b': jnp.zeros((1, n_embd), jnp.float32),
            'w_fc': nrm((n_embd, 4 * n_embd), std).astype(jnp.bfloat16),
            'b_fc': jnp.zeros((1, 4 * n_embd), jnp.float32),
            'w_mlp_proj': nrm((4 * n_embd, n_embd), std).astype(jnp.bfloat16),
            'b_mlp_proj': jnp.zeros((1, n_embd), jnp.float32),
        }
        params['blocks'].append(blk)
    return params


# ----------------------------- full forward -----------------------------------

def gpt_forward(params, idx, targets, *, n_head, vocab_size):
    B, T = idx.shape
    C = params['wpe'].shape[1]

    # Embedding gather + add: thin XLA glue (no clean simple Pallas equivalent).
    tok_emb = jnp.take(params['wte'], idx, axis=0).astype(jnp.float32)
    pos_emb = params['wpe'][:T].astype(jnp.float32)
    x = (tok_emb + pos_emb[None, :, :]).reshape(B * T, C)   # f32 residual stream

    for blk in params['blocks']:
        # attention branch
        qkv = run_ln_linear(x, blk['ln1_w'], blk['ln1_b'],
                            blk['w_qkv'], blk['b_qkv'], apply_gelu=False)
        qkv = qkv.reshape(B, T, 3 * C)
        q = qkv[:, :, 0 * C:1 * C]
        k = qkv[:, :, 1 * C:2 * C]
        v = qkv[:, :, 2 * C:3 * C]
        attn = run_flash_attention(q, k, v, n_head).reshape(B * T, C)
        x = run_matmul_residual(attn, blk['w_attn_proj'], blk['b_attn_proj'], x)

        # MLP branch
        h = run_ln_linear(x, blk['ln2_w'], blk['ln2_b'],
                          blk['w_fc'], blk['b_fc'], apply_gelu=True)
        x = run_matmul_residual(h, blk['w_mlp_proj'], blk['b_mlp_proj'], x)

    logits_p, row_loss = run_head_and_loss(
        x, params['ln_f_w'], params['ln_f_b'], params['wte_t'],
        targets, vocab_size)

    V_pad = params['wte_t'].shape[1]
    logits = logits_p[:, :vocab_size] if V_pad != vocab_size else logits_p
    logits = logits.reshape(B, T, vocab_size)

    # mean over non-ignored targets (matches F.cross_entropy ignore_index behaviour)
    t_flat = targets.reshape(-1)
    valid = (t_flat >= 0) & (t_flat < vocab_size)
    n_valid = jnp.maximum(jnp.sum(valid.astype(jnp.float32)), 1.0)
    loss = jnp.sum(jnp.where(valid, row_loss[:, 0], 0.0)) / n_valid
    return logits, loss


# ----------------------------- main --------------------------------------------

if __name__ == "__main__":
    # Small GPT config
    VOCAB = 256
    BLOCK_SIZE = 16
    N_LAYER = 2
    N_HEAD = 4
    N_EMBD = 32
    B, T = 2, 8

    key = jax.random.PRNGKey(0)
    pkey, ikey, tkey = jax.random.split(key, 3)

    params = init_params(pkey, vocab_size=VOCAB, block_size=BLOCK_SIZE,
                         n_layer=N_LAYER, n_head=N_HEAD, n_embd=N_EMBD)

    idx = jax.random.randint(ikey, (B, T), 0, VOCAB, dtype=jnp.int32)
    targets = jax.random.randint(tkey, (B, T), 0, VOCAB, dtype=jnp.int32)

    fwd = jax.jit(functools.partial(gpt_forward, n_head=N_HEAD, vocab_size=VOCAB))
    logits, loss = fwd(params, idx, targets)
    jax.block_until_ready((logits, loss))

    assert logits.shape == (B, T, VOCAB)
    assert loss.shape == ()
    assert bool(jnp.isfinite(loss))
    print("KERNEL_OK")
</pallas_src>

<mosaic_0001>
module attributes {stable_mosaic.version = 11 : i64} {
  func.func @ln_linear_kernel(%arg0: i32, %arg1: i32, %arg2: memref<16x32xf32, #tpu.memory_space<vmem>>, %arg3: memref<1x32xf32, #tpu.memory_space<vmem>>, %arg4: memref<1x32xf32, #tpu.memory_space<vmem>>, %arg5: memref<32x96xbf16, #tpu.memory_space<vmem>>, %arg6: memref<1x96xf32, #tpu.memory_space<vmem>>, %arg7: memref<16x96xbf16, #tpu.memory_space<vmem>>) attributes {dimension_semantics = [#tpu.dimension_semantics<parallel>, #tpu.dimension_semantics<parallel>], iteration_bounds = array<i64: 1, 1>, scalar_prefetch = 0 : i64, scratch_operands = 0 : i64, tpu.core_type = #tpu.core_type<tc>, window_params = [{transform_indices = @transform_0, window_bounds = array<i64: 16, 32>}, {pipeline_mode = #tpu.pipeline_mode<synchronous>, transform_indices = @transform_1, window_bounds = array<i64: 1, 32>}, {pipeline_mode = #tpu.pipeline_mode<synchronous>, transform_indices = @transform_2, window_bounds = array<i64: 1, 32>}, {transform_indices = @transform_3, window_bounds = array<i64: 32, 96>}, {transform_indices = @transform_4, window_bounds = array<i64: 1, 96>}, {transform_indices = @transform_5, window_bounds = array<i64: 16, 96>}]} {
    %c0 = arith.constant 0 : index
    %c0_0 = arith.constant 0 : index
    %0 = vector.load %arg2[%c0, %c0_0] : memref<16x32xf32, #tpu.memory_space<vmem>>, vector<16x32xf32>
    %c0_1 = arith.constant 0 : index
    %c0_2 = arith.constant 0 : index
    %1 = vector.load %arg3[%c0_1, %c0_2] : memref<1x32xf32, #tpu.memory_space<vmem>>, vector<1x32xf32>
    %c0_3 = arith.constant 0 : index
    %c0_4 = arith.constant 0 : index
    %2 = vector.load %arg4[%c0_3, %c0_4] : memref<1x32xf32, #tpu.memory_space<vmem>>, vector<1x32xf32>
    %cst = arith.constant dense<0.000000e+00> : vector<16xf32>
    %3 = vector.multi_reduction <add>, %0, %cst [1] : vector<16x32xf32> to vector<16xf32>
    %4 = vector.shape_cast %3 : vector<16xf32> to vector<16x1xf32>
    %cst_5 = arith.constant 3.200000e+01 : f32
    %5 = vector.broadcast %cst_5 : f32 to vector<16x1xf32>
    %6 = arith.divf %4, %5 : vector<16x1xf32>
    %7 = vector.broadcast %6 : vector<16x1xf32> to vector<16x32xf32>
    %8 = arith.subf %0, %7 : vector<16x32xf32>
    %9 = arith.mulf %8, %8 : vector<16x32xf32>
    %cst_6 = arith.constant dense<0.000000e+00> : vector<16xf32>
    %10 = vector.multi_reduction <add>, %9, %cst_6 [1] : vector<16x32xf32> to vector<16xf32>
    %11 = vector.shape_cast %10 : vector<16xf32> to vector<16x1xf32>
    %cst_7 = arith.constant 3.200000e+01 : f32
    %12 = vector.broadcast %cst_7 : f32 to vector<16x1xf32>
    %13 = arith.divf %11, %12 : vector<16x1xf32>
    %14 = vector.broadcast %6 : vector<16x1xf32> to vector<16x32xf32>
    %15 = arith.subf %0, %14 : vector<16x32xf32>
    %cst_8 = arith.constant 9.99999974E-6 : f32
    %16 = vector.broadcast %cst_8 : f32 to vector<16x1xf32>
    %17 = arith.addf %13, %16 : vector<16x1xf32>
    %18 = math.rsqrt %17 : vector<16x1xf32>
    %19 = vector.broadcast %18 : vector<16x1xf32> to vector<16x32xf32>
    %20 = arith.mulf %15, %19 : vector<16x32xf32>
    %21 = vector.broadcast %1 : vector<1x32xf32> to vector<16x32xf32>
    %22 = arith.mulf %20, %21 : vector<16x32xf32>
    %23 = vector.broadcast %2 : vector<1x32xf32> to vector<16x32xf32>
    %24 = arith.addf %22, %23 : vector<16x32xf32>
    %25 = arith.truncf %24 : vector<16x32xf32> to vector<16x32xbf16>
    %c0_9 = arith.constant 0 : index
    %c0_10 = arith.constant 0 : index
    %26 = vector.load %arg5[%c0_9, %c0_10] : memref<32x96xbf16, #tpu.memory_space<vmem>>, vector<32x96xbf16>
    %cst_11 = arith.constant dense<0.000000e+00> : vector<16x96xf32>
    %27 = tpu.matmul %25, %26, %cst_11 {dimension_numbers = #tpu.dot_dimension_numbers<[1], [0], [0], [1], [0, 0, 1, 1], [], []>} : vector<16x32xbf16>, vector<32x96xbf16>, vector<16x96xf32> -> vector<16x96xf32>
    %c0_12 = arith.constant 0 : index
    %c0_13 = arith.constant 0 : index
    %28 = vector.load %arg6[%c0_12, %c0_13] : memref<1x96xf32, #tpu.memory_space<vmem>>, vector<1x96xf32>
    %29 = vector.broadcast %28 : vector<1x96xf32> to vector<16x96xf32>
    %30 = arith.addf %27, %29 : vector<16x96xf32>
    %31 = arith.truncf %30 : vector<16x96xf32> to vector<16x96xbf16>
    %c0_14 = arith.constant 0 : index
    %c0_15 = arith.constant 0 : index
    %32 = vector.load %arg7[%c0_14, %c0_15] : memref<16x96xbf16, #tpu.memory_space<vmem>>, vector<16x96xbf16>
    tpu.vector_store %arg7[%c0_14, %c0_15], %31 {strides = array<i32>} : memref<16x96xbf16, #tpu.memory_space<vmem>>, vector<16x96xbf16>,
    return
  }
  func.func @transform_0(%arg0: i32, %arg1: i32) -> (i32, i32) {
    %c0_i32 = arith.constant 0 : i32
    %c0_i32_0 = arith.constant 0 : i32
    return %arg0, %c0_i32 : i32, i32
  }
  func.func @transform_1(%arg0: i32, %arg1: i32) -> (i32, i32) {
    %c0_i32 = arith.constant 0 : i32
    %c0_i32_0 = arith.constant 0 : i32
    %c0_i32_1 = arith.constant 0 : i32
    return %c0_i32, %c0_i32_0 : i32, i32
  }
  func.func @transform_2(%arg0: i32, %arg1: i32) -> (i32, i32) {
    %c0_i32 = arith.constant 0 : i32
    %c0_i32_0 = arith.constant 0 : i32
    %c0_i32_1 = arith.constant 0 : i32
    return %c0_i32, %c0_i32_0 : i32, i32
  }
  func.func @transform_3(%arg0: i32, %arg1: i32) -> (i32, i32) {
    %c0_i32 = arith.constant 0 : i32
    %c0_i32_0 = arith.constant 0 : i32
    return %c0_i32, %arg1 : i32, i32
  }
  func.func @transform_4(%arg0: i32, %arg1: i32) -> (i32, i32) {
    %c0_i32 = arith.constant 0 : i32
    %c0_i32_0 = arith.constant 0 : i32
    return %c0_i32, %arg1 : i32, i32
  }
  func.func @transform_5(%arg0: i32, %arg1: i32) -> (i32, i32) {
    %c0_i32 = arith.constant 0 : i32
    return %arg0, %arg1 : i32, i32
  }
}

module attributes {stable_mosaic.version = 11 : i64} {
  func.func @matmul_residual_kernel(%arg0: i32, %arg1: i32, %arg2: memref<16x32xbf16, #tpu.memory_space<vmem>>, %arg3: memref<32x32xbf16, #tpu.memory_space<vmem>>, %arg4: memref<1x32xf32, #tpu.memory_space<vmem>>, %arg5: memref<16x32xf32, #tpu.memory_space<vmem>>, %arg6: memref<16x32xf32, #tpu.memory_space<vmem>>) attributes {dimension_semantics = [#tpu.dimension_semantics<parallel>, #tpu.dimension_semantics<parallel>], iteration_bounds = array<i64: 1, 1>, scalar_prefetch = 0 : i64, scratch_operands = 0 : i64, tpu.core_type = #tpu.core_type<tc>, window_params = [{transform_indices = @transform_0, window_bounds = array<i64: 16, 32>}, {transform_indices = @transform_1, window_bounds = array<i64: 32, 32>}, {transform_indices = @transform_2, window_bounds = array<i64: 1, 32>}, {transform_indices = @transform_3, window_bounds = array<i64: 16, 32>}, {transform_indices = @transform_4, window_bounds = array<i64: 16, 32>}]} {
    %c0 = arith.constant 0 : index
    %c0_0 = arith.constant 0 : index
    %0 = vector.load %arg2[%c0, %c0_0] : memref<16x32xbf16, #tpu.memory_space<vmem>>, vector<16x32xbf16>
    %c0_1 = arith.constant 0 : index
    %c0_2 = arith.constant 0 : index
    %1 = vector.load %arg3[%c0_1, %c0_2] : memref<32x32xbf16, #tpu.memory_space<vmem>>, vector<32x32xbf16>
    %cst = arith.constant dense<0.000000e+00> : vector<16x32xf32>
    %2 = tpu.matmul %0, %1, %cst {dimension_numbers = #tpu.dot_dimension_numbers<[1], [0], [0], [1], [0, 0, 1, 1], [], []>} : vector<16x32xbf16>, vector<32x32xbf16>, vector<16x32xf32> -> vector<16x32xf32>
    %c0_3 = arith.constant 0 : index
    %c0_4 = arith.constant 0 : index
    %3 = vector.load %arg4[%c0_3, %c0_4] : memref<1x32xf32, #tpu.memory_space<vmem>>, vector<1x32xf32>
    %4 = vector.broadcast %3 : vector<1x32xf32> to vector<16x32xf32>
    %5 = arith.addf %2, %4 : vector<16x32xf32>
    %c0_5 = arith.constant 0 : index
    %c0_6 = arith.constant 0 : index
    %6 = vector.load %arg5[%c0_5, %c0_6] : memref<16x32xf32, #tpu.memory_space<vmem>>, vector<16x32xf32>
    %7 = arith.addf %6, %5 : vector<16x32xf32>
    %c0_7 = arith.constant 0 : index
    %c0_8 = arith.constant 0 : index
    %8 = vector.load %arg6[%c0_7, %c0_8] : memref<16x32xf32, #tpu.memory_space<vmem>>, vector<16x32xf32>
    tpu.vector_store %arg6[%c0_7, %c0_8], %7 {strides = array<i32>} : memref<16x32xf32, #tpu.memory_space<vmem>>, vector<16x32xf32>,
    return
  }
  func.func @transform_0(%arg0: i32, %arg1: i32) -> (i32, i32) {
    %c0_i32 = arith.constant 0 : i32
    %c0_i32_0 = arith.constant 0 : i32
    return %arg0, %c0_i32 : i32, i32
  }
  func.func @transform_1(%arg0: i32, %arg1: i32) -> (i32, i32) {
    %c0_i32 = arith.constant 0 : i32
    %c0_i32_0 = arith.constant 0 : i32
    return %c0_i32, %arg1 : i32, i32
  }
  func.func @transform_2(%arg0: i32, %arg1: i32) -> (i32, i32) {
    %c0_i32 = arith.constant 0 : i32
    %c0_i32_0 = arith.constant 0 : i32
    return %c0_i32, %arg1 : i32, i32
  }
  func.func @transform_3(%arg0: i32, %arg1: i32) -> (i32, i32) {
    %c0_i32 = arith.constant 0 : i32
    return %arg0, %arg1 : i32, i32
  }
  func.func @transform_4(%arg0: i32, %arg1: i32) -> (i32, i32) {
    %c0_i32 = arith.constant 0 : i32
    return %arg0, %arg1 : i32, i32
  }
}

module attributes {stable_mosaic.version = 11 : i64} {
  func.func @flash_attn_kernel(%arg0: i32, %arg1: i32, %arg2: i32, %arg3: memref<1x8x32xbf16, #tpu.memory_space<vmem>>, %arg4: memref<1x8x32xbf16, #tpu.memory_space<vmem>>, %arg5: memref<1x8x32xbf16, #tpu.memory_space<vmem>>, %arg6: memref<1x8x32xbf16, #tpu.memory_space<vmem>>, %arg7: memref<4x8x8xf32, #tpu.memory_space<vmem>>, %arg8: memref<4x8x1xf32, #tpu.memory_space<vmem>>, %arg9: memref<4x8x1xf32, #tpu.memory_space<vmem>>) attributes {dimension_semantics = [#tpu.dimension_semantics<parallel>, #tpu.dimension_semantics<parallel>, #tpu.dimension_semantics<arbitrary>], iteration_bounds = array<i64: 2, 1, 1>, scalar_prefetch = 0 : i64, scratch_operands = 3 : i64, tpu.core_type = #tpu.core_type<tc>, window_params = [{transform_indices = @transform_0, window_bounds = array<i64: 1, 8, 32>}, {transform_indices = @transform_1, window_bounds = array<i64: 1, 8, 32>}, {transform_indices = @transform_2, window_bounds = array<i64: 1, 8, 32>}, {transform_indices = @transform_3, window_bounds = array<i64: 1, 8, 32>}]} {
    %c0_i32 = arith.constant 0 : i32
    %0 = arith.cmpi eq, %arg2, %c0_i32 : i32
    %1 = arith.extui %0 : i1 to i32
    %c0_i32_0 = arith.constant 0 : i32
    %2 = arith.cmpi ne, %1, %c0_i32_0 : i32
    scf.if %2 {
      %cst = arith.constant 0.000000e+00 : f32
      %9 = vector.broadcast %cst : f32 to vector<4x8x8xf32>
      %c0 = arith.constant 0 : index
      %c0_4 = arith.constant 0 : index
      %c0_5 = arith.constant 0 : index
      %10 = vector.load %arg7[%c0, %c0_4, %c0_5] : memref<4x8x8xf32, #tpu.memory_space<vmem>>, vector<4x8x8xf32>
      tpu.vector_store %arg7[%c0, %c0_4, %c0_5], %9 {strides = array<i32>} : memref<4x8x8xf32, #tpu.memory_space<vmem>>, vector<4x8x8xf32>,
      %cst_6 = arith.constant -1.000000e+30 : f32
      %11 = vector.broadcast %cst_6 : f32 to vector<4x8x1xf32>
      %c0_7 = arith.constant 0 : index
      %c0_8 = arith.constant 0 : index
      %c0_9 = arith.constant 0 : index
      %12 = vector.load %arg8[%c0_7, %c0_8, %c0_9] : memref<4x8x1xf32, #tpu.memory_space<vmem>>, vector<4x8x1xf32>
      tpu.vector_store %arg8[%c0_7, %c0_8, %c0_9], %11 {strides = array<i32>} : memref<4x8x1xf32, #tpu.memory_space<vmem>>, vector<4x8x1xf32>,
      %cst_10 = arith.constant 0.000000e+00 : f32
      %13 = vector.broadcast %cst_10 : f32 to vector<4x8x1xf32>
      %c0_11 = arith.constant 0 : index
      %c0_12 = arith.constant 0 : index
      %c0_13 = arith.constant 0 : index
      %14 = vector.load %arg9[%c0_11, %c0_12, %c0_13] : memref<4x8x1xf32, #tpu.memory_space<vmem>>, vector<4x8x1xf32>
      tpu.vector_store %arg9[%c0_11, %c0_12, %c0_13], %13 {strides = array<i32>} : memref<4x8x1xf32, #tpu.memory_space<vmem>>, vector<4x8x1xf32>,
    } else {
    }
    %3 = arith.cmpi sle, %arg2, %arg1 : i32
    %4 = arith.extui %3 : i1 to i32
    %c0_i32_1 = arith.constant 0 : i32
    %5 = arith.cmpi ne, %4, %c0_i32_1 : i32
    scf.if %5 {
      %c0 = arith.constant 0 : index
      %c0_4 = arith.constant 0 : index
      %c0_5 = arith.constant 0 : index
      %9 = vector.load %arg3[%c0, %c0_4, %c0_5] : memref<1x8x32xbf16, #tpu.memory_space<vmem>>, vector<1x8x32xbf16>
      %10 = vector.shape_cast %9 : vector<1x8x32xbf16> to vector<8x32xbf16>
      %11 = vector.shape_cast %10 : vector<8x32xbf16> to vector<8x4x8xbf16>
      %c0_6 = arith.constant 0 : index
      %c0_7 = arith.constant 0 : index
      %c0_8 = arith.constant 0 : index
      %12 = vector.load %arg4[%c0_6, %c0_7, %c0_8] : memref<1x8x32xbf16, #tpu.memory_space<vmem>>, vector<1x8x32xbf16>
      %13 = vector.shape_cast %12 : vector<1x8x32xbf16> to vector<8x32xbf16>
      %14 = vector.shape_cast %13 : vector<8x32xbf16> to vector<8x4x8xbf16>
      %c0_9 = arith.constant 0 : index
      %c0_10 = arith.constant 0 : index
      %c0_11 = arith.constant 0 : index
      %15 = vector.load %arg5[%c0_9, %c0_10, %c0_11] : memref<1x8x32xbf16, #tpu.memory_space<vmem>>, vector<1x8x32xbf16>
      %16 = vector.shape_cast %15 : vector<1x8x32xbf16> to vector<8x32xbf16>
      %17 = vector.shape_cast %16 : vector<8x32xbf16> to vector<8x4x8xbf16>
      "tpu.trace_start"() <{level = 10 : i32, message = "qhd,khd->hqk"}> : () -> ()
      %cst = arith.constant dense<0.000000e+00> : vector<4x8x8xf32>
      %18 = tpu.matmul %11, %14, %cst {dimension_numbers = #tpu.dot_dimension_numbers<[2], [2], [0], [0], [0, 1, 0, 0, 1, 0], [1], [1]>} : vector<8x4x8xbf16>, vector<8x4x8xbf16>, vector<4x8x8xf32> -> vector<4x8x8xf32>
      "tpu.trace_stop"() : () -> ()
      %19 = tpu.iota {dimensions = array<i32: 0>} : vector<8x8xi32>
      %c8_i32 = arith.constant 8 : i32
      %20 = arith.muli %arg1, %c8_i32 : i32
      %21 = vector.broadcast %20 : i32 to vector<8x8xi32>
      %22 = arith.addi %19, %21 : vector<8x8xi32>
      %23 = tpu.iota {dimensions = array<i32: 1>} : vector<8x8xi32>
      %c8_i32_12 = arith.constant 8 : i32
      %24 = arith.muli %arg2, %c8_i32_12 : i32
      %25 = vector.broadcast %24 : i32 to vector<8x8xi32>
      %26 = arith.addi %23, %25 : vector<8x8xi32>
      %27 = arith.cmpi sle, %26, %22 : vector<8x8xi32>
      %28 = vector.shape_cast %27 : vector<8x8xi1> to vector<1x8x8xi1>
      %cst_13 = arith.constant -1.000000e+30 : f32
      %29 = vector.shape_cast %28 : vector<1x8x8xi1> to vector<1x8x8xi1>
      %30 = vector.broadcast %29 : vector<1x8x8xi1> to vector<4x8x8xi1>
      %31 = vector.broadcast %cst_13 : f32 to vector<4x8x8xf32>
      %32 = arith.select %30, %18, %31 : vector<4x8x8xi1>, vector<4x8x8xf32>
      %c0_14 = arith.constant 0 : index
      %c0_15 = arith.constant 0 : index
      %c0_16 = arith.constant 0 : index
      %33 = vector.load %arg8[%c0_14, %c0_15, %c0_16] : memref<4x8x1xf32, #tpu.memory_space<vmem>>, vector<4x8x1xf32>
      %cst_17 = arith.constant dense<0xFF800000> : vector<4x8xf32>
      %34 = vector.multi_reduction <maximumf>, %32, %cst_17 [2] : vector<4x8x8xf32> to vector<4x8xf32>
      %35 = vector.shape_cast %34 : vector<4x8xf32> to vector<4x8x1xf32>
      %36 = arith.maximumf %33, %35 : vector<4x8x1xf32>
      %37 = arith.subf %33, %36 : vector<4x8x1xf32>
      %38 = math.exp %37 : vector<4x8x1xf32>
      %39 = vector.broadcast %36 : vector<4x8x1xf32> to vector<4x8x8xf32>
      %40 = arith.subf %32, %39 : vector<4x8x8xf32>
      %41 = math.exp %40 : vector<4x8x8xf32>
      %c0_18 = arith.constant 0 : index
      %c0_19 = arith.constant 0 : index
      %c0_20 = arith.constant 0 : index
      %42 = vector.load %arg9[%c0_18, %c0_19, %c0_20] : memref<4x8x1xf32, #tpu.memory_space<vmem>>, vector<4x8x1xf32>
      %43 = arith.mulf %38, %42 : vector<4x8x1xf32>
      %cst_21 = arith.constant dense<0.000000e+00> : vector<4x8xf32>
      %44 = vector.multi_reduction <add>, %41, %cst_21 [2] : vector<4x8x8xf32> to vector<4x8xf32>
      %45 = vector.shape_cast %44 : vector<4x8xf32> to vector<4x8x1xf32>
      %46 = arith.addf %43, %45 : vector<4x8x1xf32>
      %c0_22 = arith.constant 0 : index
      %c0_23 = arith.constant 0 : index
      %c0_24 = arith.constant 0 : index
      %47 = vector.load %arg9[%c0_22, %c0_23, %c0_24] : memref<4x8x1xf32, #tpu.memory_space<vmem>>, vector<4x8x1xf32>
      tpu.vector_store %arg9[%c0_22, %c0_23, %c0_24], %46 {strides = array<i32>} : memref<4x8x1xf32, #tpu.memory_space<vmem>>, vector<4x8x1xf32>,
      %c0_25 = arith.constant 0 : index
      %c0_26 = arith.constant 0 : index
      %c0_27 = arith.constant 0 : index
      %48 = vector.load %arg7[%c0_25, %c0_26, %c0_27] : memref<4x8x8xf32, #tpu.memory_space<vmem>>, vector<4x8x8xf32>
      %49 = vector.broadcast %38 : vector<4x8x1xf32> to vector<4x8x8xf32>
      %50 = arith.mulf %49, %48 : vector<4x8x8xf32>
      %51 = arith.truncf %41 : vector<4x8x8xf32> to vector<4x8x8xbf16>
      "tpu.trace_start"() <{level = 10 : i32, message = "hqk,khd->hqd"}> : () -> ()
      %cst_28 = arith.constant dense<0.000000e+00> : vector<4x8x8xf32>
      %52 = tpu.matmul %51, %17, %cst_28 {dimension_numbers = #tpu.dot_dimension_numbers<[2], [0], [1], [2], [0, 0, 0, 1, 1, 2], [0], [1]>} : vector<4x8x8xbf16>, vector<8x4x8xbf16>, vector<4x8x8xf32> -> vector<4x8x8xf32>
      "tpu.trace_stop"() : () -> ()
      %53 = arith.addf %50, %52 : vector<4x8x8xf32>
      %c0_29 = arith.constant 0 : index
      %c0_30 = arith.constant 0 : index
      %c0_31 = arith.constant 0 : index
      %54 = vector.load %arg7[%c0_29, %c0_30, %c0_31] : memref<4x8x8xf32, #tpu.memory_space<vmem>>, vector<4x8x8xf32>
      tpu.vector_store %arg7[%c0_29, %c0_30, %c0_31], %53 {strides = array<i32>} : memref<4x8x8xf32, #tpu.memory_space<vmem>>, vector<4x8x8xf32>,
      %c0_32 = arith.constant 0 : index
      %c0_33 = arith.constant 0 : index
      %c0_34 = arith.constant 0 : index
      %55 = vector.load %arg8[%c0_32, %c0_33, %c0_34] : memref<4x8x1xf32, #tpu.memory_space<vmem>>, vector<4x8x1xf32>
      tpu.vector_store %arg8[%c0_32, %c0_33, %c0_34], %36 {strides = array<i32>} : memref<4x8x1xf32, #tpu.memory_space<vmem>>, vector<4x8x1xf32>,
    } else {
    }
    %c0_i32_2 = arith.constant 0 : i32
    %6 = arith.cmpi eq, %arg2, %c0_i32_2 : i32
    %7 = arith.extui %6 : i1 to i32
    %c0_i32_3 = arith.constant 0 : i32
    %8 = arith.cmpi ne, %7, %c0_i32_3 : i32
    scf.if %8 {
      %c0 = arith.constant 0 : index
      %c0_4 = arith.constant 0 : index
      %c0_5 = arith.constant 0 : index
      %9 = vector.load %arg7[%c0, %c0_4, %c0_5] : memref<4x8x8xf32, #tpu.memory_space<vmem>>, vector<4x8x8xf32>
      %c0_6 = arith.constant 0 : index
      %c0_7 = arith.constant 0 : index
      %c0_8 = arith.constant 0 : index
      %10 = vector.load %arg9[%c0_6, %c0_7, %c0_8] : memref<4x8x1xf32, #tpu.memory_space<vmem>>, vector<4x8x1xf32>
      %11 = tpu.reciprocal %10 {approx = true} : vector<4x8x1xf32> -> vector<4x8x1xf32>
      %12 = vector.broadcast %11 : vector<4x8x1xf32> to vector<4x8x8xf32>
      %13 = arith.mulf %9, %12 : vector<4x8x8xf32>
      %14 = tpu.transpose %13, [1, 0, 2] : vector<4x8x8xf32> -> vector<8x4x8xf32>
      %15 = vector.shape_cast %14 : vector<8x4x8xf32> to vector<8x32xf32>
      %16 = arith.truncf %15 : vector<8x32xf32> to vector<8x32xbf16>
      %c0_9 = arith.constant 0 : index
      %c0_10 = arith.constant 0 : index
      %c0_11 = arith.constant 0 : index
      %17 = vector.load %arg6[%c0_9, %c0_10, %c0_11] : memref<1x8x32xbf16, #tpu.memory_space<vmem>>, vector<1x8x32xbf16>
      %18 = vector.shape_cast %17 : vector<1x8x32xbf16> to vector<8x32xbf16>
      %19 = vector.shape_cast %16 : vector<8x32xbf16> to vector<1x8x32xbf16>
      tpu.vector_store %arg6[%c0_9, %c0_10, %c0_11], %19 {strides = array<i32>} : memref<1x8x32xbf16, #tpu.memory_space<vmem>>, vector<1x8x32xbf16>,
    } else {
    }
    return
  }
  func.func @transform_0(%arg0: i32, %arg1: i32, %arg2: i32) -> (i32, i32, i32) {
    %c0_i32 = arith.constant 0 : i32
    %c0_i32_0 = arith.constant 0 : i32
    return %arg0, %arg1, %c0_i32 : i32, i32, i32
  }
  func.func @transform_1(%arg0: i32, %arg1: i32, %arg2: i32) -> (i32, i32, i32) {
    %c0_i32 = arith.constant 0 : i32
    %c0_i32_0 = arith.constant 0 : i32
    return %arg0, %arg2, %c0_i32 : i32, i32, i32
  }
  func.func @transform_2(%arg0: i32, %arg1: i32, %arg2: i32) -> (i32, i32, i32) {
    %c0_i32 = arith.constant 0 : i32
    %c0_i32_0 = arith.constant 0 : i32
    return %arg0, %arg2, %c0_i32 : i32, i32, i32
  }
  func.func @transform_3(%arg0: i32, %arg1: i32, %arg2: i32) -> (i32, i32, i32) {
    %c0_i32 = arith.constant 0 : i32
    %c0_i32_0 = arith.constant 0 : i32
    return %arg0, %arg1, %c0_i32 : i32, i32, i32
  }
}

module attributes {stable_mosaic.version = 11 : i64} {
  func.func @ln_linear_kernel(%arg0: i32, %arg1: i32, %arg2: memref<16x32xf32, #tpu.memory_space<vmem>>, %arg3: memref<1x32xf32, #tpu.memory_space<vmem>>, %arg4: memref<1x32xf32, #tpu.memory_space<vmem>>, %arg5: memref<32x128xbf16, #tpu.memory_space<vmem>>, %arg6: memref<1x128xf32, #tpu.memory_space<vmem>>, %arg7: memref<16x128xbf16, #tpu.memory_space<vmem>>) attributes {dimension_semantics = [#tpu.dimension_semantics<parallel>, #tpu.dimension_semantics<parallel>], iteration_bounds = array<i64: 1, 1>, scalar_prefetch = 0 : i64, scratch_operands = 0 : i64, tpu.core_type = #tpu.core_type<tc>, window_params = [{transform_indices = @transform_0, window_bounds = array<i64: 16, 32>}, {pipeline_mode = #tpu.pipeline_mode<synchronous>, transform_indices = @transform_1, window_bounds = array<i64: 1, 32>}, {pipeline_mode = #tpu.pipeline_mode<synchronous>, transform_indices = @transform_2, window_bounds = array<i64: 1, 32>}, {transform_indices = @transform_3, window_bounds = array<i64: 32, 128>}, {transform_indices = @transform_4, window_bounds = array<i64: 1, 128>}, {transform_indices = @transform_5, window_bounds = array<i64: 16, 128>}]} {
    %c0 = arith.constant 0 : index
    %c0_0 = arith.constant 0 : index
    %0 = vector.load %arg2[%c0, %c0_0] : memref<16x32xf32, #tpu.memory_space<vmem>>, vector<16x32xf32>
    %c0_1 = arith.constant 0 : index
    %c0_2 = arith.constant 0 : index
    %1 = vector.load %arg3[%c0_1, %c0_2] : memref<1x32xf32, #tpu.memory_space<vmem>>, vector<1x32xf32>
    %c0_3 = arith.constant 0 : index
    %c0_4 = arith.constant 0 : index
    %2 = vector.load %arg4[%c0_3, %c0_4] : memref<1x32xf32, #tpu.memory_space<vmem>>, vector<1x32xf32>
    %cst = arith.constant dense<0.000000e+00> : vector<16xf32>
    %3 = vector.multi_reduction <add>, %0, %cst [1] : vector<16x32xf32> to vector<16xf32>
    %4 = vector.shape_cast %3 : vector<16xf32> to vector<16x1xf32>
    %cst_5 = arith.constant 3.200000e+01 : f32
    %5 = vector.broadcast %cst_5 : f32 to vector<16x1xf32>
    %6 = arith.divf %4, %5 : vector<16x1xf32>
    %7 = vector.broadcast %6 : vector<16x1xf32> to vector<16x32xf32>
    %8 = arith.subf %0, %7 : vector<16x32xf32>
    %9 = arith.mulf %8, %8 : vector<16x32xf32>
    %cst_6 = arith.constant dense<0.000000e+00> : vector<16xf32>
    %10 = vector.multi_reduction <add>, %9, %cst_6 [1] : vector<16x32xf32> to vector<16xf32>
    %11 = vector.shape_cast %10 : vector<16xf32> to vector<16x1xf32>
    %cst_7 = arith.constant 3.200000e+01 : f32
    %12 = vector.broadcast %cst_7 : f32 to vector<16x1xf32>
    %13 = arith.divf %11, %12 : vector<16x1xf32>
    %14 = vector.broadcast %6 : vector<16x1xf32> to vector<16x32xf32>
    %15 = arith.subf %0, %14 : vector<16x32xf32>
    %cst_8 = arith.constant 9.99999974E-6 : f32
    %16 = vector.broadcast %cst_8 : f32 to vector<16x1xf32>
    %17 = arith.addf %13, %16 : vector<16x1xf32>
    %18 = math.rsqrt %17 : vector<16x1xf32>
    %19 = vector.broadcast %18 : vector<16x1xf32> to vector<16x32xf32>
    %20 = arith.mulf %15, %19 : vector<16x32xf32>
    %21 = vector.broadcast %1 : vector<1x32xf32> to vector<16x32xf32>
    %22 = arith.mulf %20, %21 : vector<16x32xf32>
    %23 = vector.broadcast %2 : vector<1x32xf32> to vector<16x32xf32>
    %24 = arith.addf %22, %23 : vector<16x32xf32>
    %25 = arith.truncf %24 : vector<16x32xf32> to vector<16x32xbf16>
    %c0_9 = arith.constant 0 : index
    %c0_10 = arith.constant 0 : index
    %26 = vector.load %arg5[%c0_9, %c0_10] : memref<32x128xbf16, #tpu.memory_space<vmem>>, vector<32x128xbf16>
    %cst_11 = arith.constant dense<0.000000e+00> : vector<16x128xf32>
    %27 = tpu.matmul %25, %26, %cst_11 {dimension_numbers = #tpu.dot_dimension_numbers<[1], [0], [0], [1], [0, 0, 1, 1], [], []>} : vector<16x32xbf16>, vector<32x128xbf16>, vector<16x128xf32> -> vector<16x128xf32>
    %c0_12 = arith.constant 0 : index
    %c0_13 = arith.constant 0 : index
    %28 = vector.load %arg6[%c0_12, %c0_13] : memref<1x128xf32, #tpu.memory_space<vmem>>, vector<1x128xf32>
    %29 = vector.broadcast %28 : vector<1x128xf32> to vector<16x128xf32>
    %30 = arith.addf %27, %29 : vector<16x128xf32>
    %cst_14 = arith.constant 5.000000e-01 : f32
    %31 = vector.broadcast %cst_14 : f32 to vector<16x128xf32>
    %32 = arith.mulf %31, %30 : vector<16x128xf32>
    %cst_15 = arith.constant 4.471500e-02 : f32
    %33 = vector.broadcast %cst_15 : f32 to vector<16x128xf32>
    %34 = arith.mulf %33, %30 : vector<16x128xf32>
    %35 = arith.mulf %34, %30 : vector<16x128xf32>
    %36 = arith.mulf %35, %30 : vector<16x128xf32>
    %37 = arith.addf %30, %36 : vector<16x128xf32>
    %cst_16 = arith.constant 0.797884583 : f32
    %38 = vector.broadcast %cst_16 : f32 to vector<16x128xf32>
    %39 = arith.mulf %38, %37 : vector<16x128xf32>
    %40 = math.tanh %39 : vector<16x128xf32>
    %cst_17 = arith.constant 1.000000e+00 : f32
    %41 = vector.broadcast %cst_17 : f32 to vector<16x128xf32>
    %42 = arith.addf %41, %40 : vector<16x128xf32>
    %43 = arith.mulf %32, %42 : vector<16x128xf32>
    %44 = arith.truncf %43 : vector<16x128xf32> to vector<16x128xbf16>
    %c0_18 = arith.constant 0 : index
    %c0_19 = arith.constant 0 : index
    %45 = vector.load %arg7[%c0_18, %c0_19] : memref<16x128xbf16, #tpu.memory_space<vmem>>, vector<16x128xbf16>
    tpu.vector_store %arg7[%c0_18, %c0_19], %44 {strides = array<i32>} : memref<16x128xbf16, #tpu.memory_space<vmem>>, vector<16x128xbf16>,
    return
  }
  func.func @transform_0(%arg0: i32, %arg1: i32) -> (i32, i32) {
    %c0_i32 = arith.constant 0 : i32
    %c0_i32_0 = arith.constant 0 : i32
    return %arg0, %c0_i32 : i32, i32
  }
  func.func @transform_1(%arg0: i32, %arg1: i32) -> (i32, i32) {
    %c0_i32 = arith.constant 0 : i32
    %c0_i32_0 = arith.constant 0 : i32
    %c0_i32_1 = arith.constant 0 : i32
    return %c0_i32, %c0_i32_0 : i32, i32
  }
  func.func @transform_2(%arg0: i32, %arg1: i32) -> (i32, i32) {
    %c0_i32 = arith.constant 0 : i32
    %c0_i32_0 = arith.constant 0 : i32
    %c0_i32_1 = arith.constant 0 : i32
    return %c0_i32, %c0_i32_0 : i32, i32
  }
  func.func @transform_3(%arg0: i32, %arg1: i32) -> (i32, i32) {
    %c0_i32 = arith.constant 0 : i32
    %c0_i32_0 = arith.constant 0 : i32
    return %c0_i32, %arg1 : i32, i32
  }
  func.func @transform_4(%arg0: i32, %arg1: i32) -> (i32, i32) {
    %c0_i32 = arith.constant 0 : i32
    %c0_i32_0 = arith.constant 0 : i32
    return %c0_i32, %arg1 : i32, i32
  }
  func.func @transform_5(%arg0: i32, %arg1: i32) -> (i32, i32) {
    %c0_i32 = arith.constant 0 : i32
    return %arg0, %arg1 : i32, i32
  }
}

module attributes {stable_mosaic.version = 11 : i64} {
  func.func @matmul_residual_kernel(%arg0: i32, %arg1: i32, %arg2: memref<16x128xbf16, #tpu.memory_space<vmem>>, %arg3: memref<128x32xbf16, #tpu.memory_space<vmem>>, %arg4: memref<1x32xf32, #tpu.memory_space<vmem>>, %arg5: memref<16x32xf32, #tpu.memory_space<vmem>>, %arg6: memref<16x32xf32, #tpu.memory_space<vmem>>) attributes {dimension_semantics = [#tpu.dimension_semantics<parallel>, #tpu.dimension_semantics<parallel>], iteration_bounds = array<i64: 1, 1>, scalar_prefetch = 0 : i64, scratch_operands = 0 : i64, tpu.core_type = #tpu.core_type<tc>, window_params = [{transform_indices = @transform_0, window_bounds = array<i64: 16, 128>}, {transform_indices = @transform_1, window_bounds = array<i64: 128, 32>}, {transform_indices = @transform_2, window_bounds = array<i64: 1, 32>}, {transform_indices = @transform_3, window_bounds = array<i64: 16, 32>}, {transform_indices = @transform_4, window_bounds = array<i64: 16, 32>}]} {
    %c0 = arith.constant 0 : index
    %c0_0 = arith.constant 0 : index
    %0 = vector.load %arg2[%c0, %c0_0] : memref<16x128xbf16, #tpu.memory_space<vmem>>, vector<16x128xbf16>
    %c0_1 = arith.constant 0 : index
    %c0_2 = arith.constant 0 : index
    %1 = vector.load %arg3[%c0_1, %c0_2] : memref<128x32xbf16, #tpu.memory_space<vmem>>, vector<128x32xbf16>
    %cst = arith.constant dense<0.000000e+00> : vector<16x32xf32>
    %2 = tpu.matmul %0, %1, %cst {dimension_numbers = #tpu.dot_dimension_numbers<[1], [0], [0], [1], [0, 0, 1, 1], [], []>} : vector<16x128xbf16>, vector<128x32xbf16>, vector<16x32xf32> -> vector<16x32xf32>
    %c0_3 = arith.constant 0 : index
    %c0_4 = arith.constant 0 : index
    %3 = vector.load %arg4[%c0_3, %c0_4] : memref<1x32xf32, #tpu.memory_space<vmem>>, vector<1x32xf32>
    %4 = vector.broadcast %3 : vector<1x32xf32> to vector<16x32xf32>
    %5 = arith.addf %2, %4 : vector<16x32xf32>
    %c0_5 = arith.constant 0 : index
    %c0_6 = arith.constant 0 : index
    %6 = vector.load %arg5[%c0_5, %c0_6] : memref<16x32xf32, #tpu.memory_space<vmem>>, vector<16x32xf32>
    %7 = arith.addf %6, %5 : vector<16x32xf32>
    %c0_7 = arith.constant 0 : index
    %c0_8 = arith.constant 0 : index
    %8 = vector.load %arg6[%c0_7, %c0_8] : memref<16x32xf32, #tpu.memory_space<vmem>>, vector<16x32xf32>
    tpu.vector_store %arg6[%c0_7, %c0_8], %7 {strides = array<i32>} : memref<16x32xf32, #tpu.memory_space<vmem>>, vector<16x32xf32>,
    return
  }
  func.func @transform_0(%arg0: i32, %arg1: i32) -> (i32, i32) {
    %c0_i32 = arith.constant 0 : i32
    %c0_i32_0 = arith.constant 0 : i32
    return %arg0, %c0_i32 : i32, i32
  }
  func.func @transform_1(%arg0: i32, %arg1: i32) -> (i32, i32) {
    %c0_i32 = arith.constant 0 : i32
    %c0_i32_0 = arith.constant 0 : i32
    return %c0_i32, %arg1 : i32, i32
  }
  func.func @transform_2(%arg0: i32, %arg1: i32) -> (i32, i32) {
    %c0_i32 = arith.constant 0 : i32
    %c0_i32_0 = arith.constant 0 : i32
    return %c0_i32, %arg1 : i32, i32
  }
  func.func @transform_3(%arg0: i32, %arg1: i32) -> (i32, i32) {
    %c0_i32 = arith.constant 0 : i32
    return %arg0, %arg1 : i32, i32
  }
  func.func @transform_4(%arg0: i32, %arg1: i32) -> (i32, i32) {
    %c0_i32 = arith.constant 0 : i32
    return %arg0, %arg1 : i32, i32
  }
}

module attributes {stable_mosaic.version = 11 : i64} {
  func.func @head_loss_kernel(%arg0: i32, %arg1: i32, %arg2: memref<16x32xf32, #tpu.memory_space<vmem>>, %arg3: memref<1x32xf32, #tpu.memory_space<vmem>>, %arg4: memref<1x32xf32, #tpu.memory_space<vmem>>, %arg5: memref<32x512xbf16, #tpu.memory_space<vmem>>, %arg6: memref<16x1xi32, #tpu.memory_space<vmem>>, %arg7: memref<16x512xbf16, #tpu.memory_space<vmem>>, %arg8: memref<16x1xf32, #tpu.memory_space<vmem>>, %arg9: memref<16x32xf32, #tpu.memory_space<vmem>>, %arg10: memref<16x1xf32, #tpu.memory_space<vmem>>, %arg11: memref<16x1xf32, #tpu.memory_space<vmem>>, %arg12: memref<16x1xf32, #tpu.memory_space<vmem>>) attributes {dimension_semantics = [#tpu.dimension_semantics<parallel>, #tpu.dimension_semantics<arbitrary>], iteration_bounds = array<i64: 1, 1>, scalar_prefetch = 0 : i64, scratch_operands = 4 : i64, tpu.core_type = #tpu.core_type<tc>, window_params = [{transform_indices = @transform_0, window_bounds = array<i64: 16, 32>}, {pipeline_mode = #tpu.pipeline_mode<synchronous>, transform_indices = @transform_1, window_bounds = array<i64: 1, 32>}, {pipeline_mode = #tpu.pipeline_mode<synchronous>, transform_indices = @transform_2, window_bounds = array<i64: 1, 32>}, {transform_indices = @transform_3, window_bounds = array<i64: 32, 512>}, {transform_indices = @transform_4, window_bounds = array<i64: 16, 1>}, {transform_indices = @transform_5, window_bounds = array<i64: 16, 512>}, {transform_indices = @transform_6, window_bounds = array<i64: 16, 1>}]} {
    %c0_i32 = arith.constant 0 : i32
    %0 = arith.cmpi eq, %arg1, %c0_i32 : i32
    %1 = arith.extui %0 : i1 to i32
    %c0_i32_0 = arith.constant 0 : i32
    %2 = arith.cmpi ne, %1, %c0_i32_0 : i32
    scf.if %2 {
      %c0_27 = arith.constant 0 : index
      %c0_28 = arith.constant 0 : index
      %46 = vector.load %arg2[%c0_27, %c0_28] : memref<16x32xf32, #tpu.memory_space<vmem>>, vector<16x32xf32>
      %c0_29 = arith.constant 0 : index
      %c0_30 = arith.constant 0 : index
      %47 = vector.load %arg3[%c0_29, %c0_30] : memref<1x32xf32, #tpu.memory_space<vmem>>, vector<1x32xf32>
      %c0_31 = arith.constant 0 : index
      %c0_32 = arith.constant 0 : index
      %48 = vector.load %arg4[%c0_31, %c0_32] : memref<1x32xf32, #tpu.memory_space<vmem>>, vector<1x32xf32>
      %cst_33 = arith.constant dense<0.000000e+00> : vector<16xf32>
      %49 = vector.multi_reduction <add>, %46, %cst_33 [1] : vector<16x32xf32> to vector<16xf32>
      %50 = vector.shape_cast %49 : vector<16xf32> to vector<16x1xf32>
      %cst_34 = arith.constant 3.200000e+01 : f32
      %51 = vector.broadcast %cst_34 : f32 to vector<16x1xf32>
      %52 = arith.divf %50, %51 : vector<16x1xf32>
      %53 = vector.broadcast %52 : vector<16x1xf32> to vector<16x32xf32>
      %54 = arith.subf %46, %53 : vector<16x32xf32>
      %55 = arith.mulf %54, %54 : vector<16x32xf32>
      %cst_35 = arith.constant dense<0.000000e+00> : vector<16xf32>
      %56 = vector.multi_reduction <add>, %55, %cst_35 [1] : vector<16x32xf32> to vector<16xf32>
      %57 = vector.shape_cast %56 : vector<16xf32> to vector<16x1xf32>
      %cst_36 = arith.constant 3.200000e+01 : f32
      %58 = vector.broadcast %cst_36 : f32 to vector<16x1xf32>
      %59 = arith.divf %57, %58 : vector<16x1xf32>
      %60 = vector.broadcast %52 : vector<16x1xf32> to vector<16x32xf32>
      %61 = arith.subf %46, %60 : vector<16x32xf32>
      %cst_37 = arith.constant 9.99999974E-6 : f32
      %62 = vector.broadcast %cst_37 : f32 to vector<16x1xf32>
      %63 = arith.addf %59, %62 : vector<16x1xf32>
      %64 = math.rsqrt %63 : vector<16x1xf32>
      %65 = vector.broadcast %64 : vector<16x1xf32> to vector<16x32xf32>
      %66 = arith.mulf %61, %65 : vector<16x32xf32>
      %67 = vector.broadcast %47 : vector<1x32xf32> to vector<16x32xf32>
      %68 = arith.mulf %66, %67 : vector<16x32xf32>
      %69 = vector.broadcast %48 : vector<1x32xf32> to vector<16x32xf32>
      %70 = arith.addf %68, %69 : vector<16x32xf32>
      %c0_38 = arith.constant 0 : index
      %c0_39 = arith.constant 0 : index
      %71 = vector.load %arg9[%c0_38, %c0_39] : memref<16x32xf32, #tpu.memory_space<vmem>>, vector<16x32xf32>
      tpu.vector_store %arg9[%c0_38, %c0_39], %70 {strides = array<i32>} : memref<16x32xf32, #tpu.memory_space<vmem>>, vector<16x32xf32>,
      %cst_40 = arith.constant -1.000000e+30 : f32
      %72 = vector.broadcast %cst_40 : f32 to vector<16x1xf32>
      %c0_41 = arith.constant 0 : index
      %c0_42 = arith.constant 0 : index
      %73 = vector.load %arg10[%c0_41, %c0_42] : memref<16x1xf32, #tpu.memory_space<vmem>>, vector<16x1xf32>
      tpu.vector_store %arg10[%c0_41, %c0_42], %72 {strides = array<i32>} : memref<16x1xf32, #tpu.memory_space<vmem>>, vector<16x1xf32>,
      %cst_43 = arith.constant 0.000000e+00 : f32
      %74 = vector.broadcast %cst_43 : f32 to vector<16x1xf32>
      %c0_44 = arith.constant 0 : index
      %c0_45 = arith.constant 0 : index
      %75 = vector.load %arg11[%c0_44, %c0_45] : memref<16x1xf32, #tpu.memory_space<vmem>>, vector<16x1xf32>
      tpu.vector_store %arg11[%c0_44, %c0_45], %74 {strides = array<i32>} : memref<16x1xf32, #tpu.memory_space<vmem>>, vector<16x1xf32>,
      %cst_46 = arith.constant 0.000000e+00 : f32
      %76 = vector.broadcast %cst_46 : f32 to vector<16x1xf32>
      %c0_47 = arith.constant 0 : index
      %c0_48 = arith.constant 0 : index
      %77 = vector.load %arg12[%c0_47, %c0_48] : memref<16x1xf32, #tpu.memory_space<vmem>>, vector<16x1xf32>
      tpu.vector_store %arg12[%c0_47, %c0_48], %76 {strides = array<i32>} : memref<16x1xf32, #tpu.memory_space<vmem>>, vector<16x1xf32>,
    } else {
    }
    %c0 = arith.constant 0 : index
    %c0_1 = arith.constant 0 : index
    %3 = vector.load %arg5[%c0, %c0_1] : memref<32x512xbf16, #tpu.memory_space<vmem>>, vector<32x512xbf16>
    %c0_2 = arith.constant 0 : index
    %c0_3 = arith.constant 0 : index
    %4 = vector.load %arg9[%c0_2, %c0_3] : memref<16x32xf32, #tpu.memory_space<vmem>>, vector<16x32xf32>
    %5 = arith.truncf %4 : vector<16x32xf32> to vector<16x32xbf16>
    %cst = arith.constant dense<0.000000e+00> : vector<16x512xf32>
    %6 = tpu.matmul %5, %3, %cst {dimension_numbers = #tpu.dot_dimension_numbers<[1], [0], [0], [1], [0, 0, 1, 1], [], []>} : vector<16x32xbf16>, vector<32x512xbf16>, vector<16x512xf32> -> vector<16x512xf32>
    %7 = tpu.iota {dimensions = array<i32: 1>} : vector<16x512xi32>
    %c512_i32 = arith.constant 512 : i32
    %8 = arith.muli %arg1, %c512_i32 : i32
    %9 = vector.broadcast %8 : i32 to vector<16x512xi32>
    %10 = arith.addi %7, %9 : vector<16x512xi32>
    %c256_i32 = arith.constant 256 : i32
    %11 = vector.broadcast %c256_i32 : i32 to vector<16x512xi32>
    %12 = arith.cmpi slt, %10, %11 : vector<16x512xi32>
    %cst_4 = arith.constant -1.000000e+30 : f32
    %13 = vector.broadcast %cst_4 : f32 to vector<16x512xf32>
    %14 = arith.select %12, %6, %13 : vector<16x512xi1>, vector<16x512xf32>
    %15 = arith.truncf %14 : vector<16x512xf32> to vector<16x512xbf16>
    %c0_5 = arith.constant 0 : index
    %c0_6 = arith.constant 0 : index
    %16 = vector.load %arg7[%c0_5, %c0_6] : memref<16x512xbf16, #tpu.memory_space<vmem>>, vector<16x512xbf16>
    tpu.vector_store %arg7[%c0_5, %c0_6], %15 {strides = array<i32>} : memref<16x512xbf16, #tpu.memory_space<vmem>>, vector<16x512xbf16>,
    %c0_7 = arith.constant 0 : index
    %c0_8 = arith.constant 0 : index
    %17 = vector.load %arg10[%c0_7, %c0_8] : memref<16x1xf32, #tpu.memory_space<vmem>>, vector<16x1xf32>
    %cst_9 = arith.constant dense<0xFF800000> : vector<16xf32>
    %18 = vector.multi_reduction <maximumf>, %14, %cst_9 [1] : vector<16x512xf32> to vector<16xf32>
    %19 = vector.shape_cast %18 : vector<16xf32> to vector<16x1xf32>
    %20 = arith.maximumf %17, %19 : vector<16x1xf32>
    %21 = arith.subf %17, %20 : vector<16x1xf32>
    %22 = math.exp %21 : vector<16x1xf32>
    %c0_10 = arith.constant 0 : index
    %c0_11 = arith.constant 0 : index
    %23 = vector.load %arg11[%c0_10, %c0_11] : memref<16x1xf32, #tpu.memory_space<vmem>>, vector<16x1xf32>
    %24 = arith.mulf %22, %23 : vector<16x1xf32>
    %25 = vector.broadcast %20 : vector<16x1xf32> to vector<16x512xf32>
    %26 = arith.subf %14, %25 : vector<16x512xf32>
    %27 = math.exp %26 : vector<16x512xf32>
    %cst_12 = arith.constant dense<0.000000e+00> : vector<16xf32>
    %28 = vector.multi_reduction <add>, %27, %cst_12 [1] : vector<16x512xf32> to vector<16xf32>
    %29 = vector.shape_cast %28 : vector<16xf32> to vector<16x1xf32>
    %30 = arith.addf %24, %29 : vector<16x1xf32>
    %c0_13 = arith.constant 0 : index
    %c0_14 = arith.constant 0 : index
    %31 = vector.load %arg11[%c0_13, %c0_14] : memref<16x1xf32, #tpu.memory_space<vmem>>, vector<16x1xf32>
    tpu.vector_store %arg11[%c0_13, %c0_14], %30 {strides = array<i32>} : memref<16x1xf32, #tpu.memory_space<vmem>>, vector<16x1xf32>,
    %c0_15 = arith.constant 0 : index
    %c0_16 = arith.constant 0 : index
    %32 = vector.load %arg10[%c0_15, %c0_16] : memref<16x1xf32, #tpu.memory_space<vmem>>, vector<16x1xf32>
    tpu.vector_store %arg10[%c0_15, %c0_16], %20 {strides = array<i32>} : memref<16x1xf32, #tpu.memory_space<vmem>>, vector<16x1xf32>,
    %c0_17 = arith.constant 0 : index
    %c0_18 = arith.constant 0 : index
    %33 = vector.load %arg12[%c0_17, %c0_18] : memref<16x1xf32, #tpu.memory_space<vmem>>, vector<16x1xf32>
    %c0_19 = arith.constant 0 : index
    %c0_20 = arith.constant 0 : index
    %34 = vector.load %arg6[%c0_19, %c0_20] : memref<16x1xi32, #tpu.memory_space<vmem>>, vector<16x1xi32>
    %35 = vector.broadcast %34 : vector<16x1xi32> to vector<16x512xi32>
    %36 = arith.cmpi eq, %10, %35 : vector<16x512xi32>
    %cst_21 = arith.constant 0.000000e+00 : f32
    %37 = vector.broadcast %cst_21 : f32 to vector<16x512xf32>
    %38 = arith.select %36, %14, %37 : vector<16x512xi1>, vector<16x512xf32>
    %cst_22 = arith.constant dense<0.000000e+00> : vector<16xf32>
    %39 = vector.multi_reduction <add>, %38, %cst_22 [1] : vector<16x512xf32> to vector<16xf32>
    %40 = vector.shape_cast %39 : vector<16xf32> to vector<16x1xf32>
    %41 = arith.addf %33, %40 : vector<16x1xf32>
    %c0_23 = arith.constant 0 : index
    %c0_24 = arith.constant 0 : index
    %42 = vector.load %arg12[%c0_23, %c0_24] : memref<16x1xf32, #tpu.memory_space<vmem>>, vector<16x1xf32>
    tpu.vector_store %arg12[%c0_23, %c0_24], %41 {strides = array<i32>} : memref<16x1xf32, #tpu.memory_space<vmem>>, vector<16x1xf32>,
    %c0_i32_25 = arith.constant 0 : i32
    %43 = arith.cmpi eq, %arg1, %c0_i32_25 : i32
    %44 = arith.extui %43 : i1 to i32
    %c0_i32_26 = arith.constant 0 : i32
    %45 = arith.cmpi ne, %44, %c0_i32_26 : i32
    scf.if %45 {
      %c0_27 = arith.constant 0 : index
      %c0_28 = arith.constant 0 : index
      %46 = vector.load %arg10[%c0_27, %c0_28] : memref<16x1xf32, #tpu.memory_space<vmem>>, vector<16x1xf32>
      %c0_29 = arith.constant 0 : index
      %c0_30 = arith.constant 0 : index
      %47 = vector.load %arg11[%c0_29, %c0_30] : memref<16x1xf32, #tpu.memory_space<vmem>>, vector<16x1xf32>
      %48 = math.log %47 : vector<16x1xf32>
      %49 = arith.addf %46, %48 : vector<16x1xf32>
      %c0_31 = arith.constant 0 : index
      %c0_32 = arith.constant 0 : index
      %50 = vector.load %arg12[%c0_31, %c0_32] : memref<16x1xf32, #tpu.memory_space<vmem>>, vector<16x1xf32>
      %51 = arith.subf %49, %50 : vector<16x1xf32>
      %c0_33 = arith.constant 0 : index
      %c0_34 = arith.constant 0 : index
      %52 = vector.load %arg8[%c0_33, %c0_34] : memref<16x1xf32, #tpu.memory_space<vmem>>, vector<16x1xf32>
      tpu.vector_store %arg8[%c0_33, %c0_34], %51 {strides = array<i32>} : memref<16x1xf32, #tpu.memory_space<vmem>>, vector<16x1xf32>,
    } else {
    }
    return
  }
  func.func @transform_0(%arg0: i32, %arg1: i32) -> (i32, i32) {
    %c0_i32 = arith.constant 0 : i32
    %c0_i32_0 = arith.constant 0 : i32
    return %arg0, %c0_i32 : i32, i32
  }
  func.func @transform_1(%arg0: i32, %arg1: i32) -> (i32, i32) {
    %c0_i32 = arith.constant 0 : i32
    %c0_i32_0 = arith.constant 0 : i32
    %c0_i32_1 = arith.constant 0 : i32
    return %c0_i32, %c0_i32_0 : i32, i32
  }
  func.func @transform_2(%arg0: i32, %arg1: i32) -> (i32, i32) {
    %c0_i32 = arith.constant 0 : i32
    %c0_i32_0 = arith.constant 0 : i32
    %c0_i32_1 = arith.constant 0 : i32
    return %c0_i32, %c0_i32_0 : i32, i32
  }
  func.func @transform_3(%arg0: i32, %arg1: i32) -> (i32, i32) {
    %c0_i32 = arith.constant 0 : i32
    %c0_i32_0 = arith.constant 0 : i32
    return %c0_i32, %arg1 : i32, i32
  }
  func.func @transform_4(%arg0: i32, %arg1: i32) -> (i32, i32) {
    %c0_i32 = arith.constant 0 : i32
    %c0_i32_0 = arith.constant 0 : i32
    return %arg0, %c0_i32 : i32, i32
  }
  func.func @transform_5(%arg0: i32, %arg1: i32) -> (i32, i32) {
    %c0_i32 = arith.constant 0 : i32
    return %arg0, %arg1 : i32, i32
  }
  func.func @transform_6(%arg0: i32, %arg1: i32) -> (i32, i32) {
    %c0_i32 = arith.constant 0 : i32
    %c0_i32_0 = arith.constant 0 : i32
    return %arg0, %c0_i32 : i32, i32
  }
}

</mosaic_0001>

<bundles_post_ra>
// kernel: gpt_forward.13
= control target key start
LH: loop header
LB: loop body
LE: loop exit
PB: predicated region body
PF: predicated region fallthrough
CT: control target
= control target key end

     0   :  { %v124_v0 = vmov 0.0   ;;  %vm125_vm0 = vmmov 0   ;;  %vm48_vm1 = vcmask 261120   ;;  %s178_s1 = inlined_call_operand.vmem [shape: bf16[32,32], index: 1, kind: input, shape index: {}]   ;;  %s179_s0 = inlined_call_operand.vmem [shape: bf16[16,32], index: 0, kind: input, shape index: {}]   ;;  %s180_s2 = inlined_call_operand.vmem [shape: f32[1,32], index: 2, kind: input, shape index: {}]   ;;  %s181_s3 = inlined_call_operand.vmem [shape: f32[16,32], index: 3, kind: input, shape index: {}, may-alias: {3,4}]   ;;  %s182_s4 = inlined_call_operand.vmem [shape: f32[16,32], index: 4, kind: output, shape index: {}, may-alias: {3,4}]  }
   0x1   :  { %111 = vmatprep.subr.bf16.mxu0 %v124_v0  ;;  %v121_v1 = vld [vmem:[%s178_s1 + $0x8] sm:$0xff]   ;;  %115 = vmatprep.mubr.msk.bf16.mxu0 %vm125_vm0, %v124_v0  ;;  %v122_v2 = vld [vmem:[%s178_s1] sm:$0xff]  }
   0x2   :  { %112 = vmatpush3.bf16.msra.mxu0 %v121_v1  ;;  %v123_v3 = vld [vmem:[%s179_s0] sm:$0xff]   ;;  %v94_v11 = vld [vmem:[%s181_s3 + $0x8] sm:$0xff] }
   0x3   :  { %113 = vmatprep.subr.bf16.mxu0 %v124_v0  ;;  %v103_v4 = vld [vmem:[%s180_s2] ss:$0 sm:$0xff] }
   0x4   :  { %v93_v6 = vld [vmem:[%s181_s3] sm:$0xff] }
   0x6   :  { %114 = vmatpush3.bf16.msra.mxu0 %v122_v2 }
   0x9   :  { %116 = vmatmul.mubr.msk.bf16.vlgmr.msra.gmra.mxu0 %vm48_vm1, %v123_v3 }
  0xc9   :  { %v86_v5 = vpop.f32.mrf.mxu0 }
  0xca   :  { %v87_v7 = vadd.f32 %v103_v4, %v86_v5 }
  0xcb   :  { %v117_v8 = vpop.f32.mrf.mxu0 }
  0xcc   :  { %v95_v9 = vadd.f32 %v93_v6, %v87_v7 }
  0xcd   :  { %v89_v10 = vpop.f32.mrf.mxu0 }
  0xce   :  { %97 = vst.msk [vmem:[%s182_s4] sm:$0xff] %vm48_vm1, %v95_v9  ;;  %v90_v12 = vadd.f32 %v103_v4, %v89_v10 }
  0xcf   :  { %v118_v13 = vpop.f32.mrf.mxu0 }
  0xd0   :  { %v96_v14 = vadd.f32 %v94_v11, %v90_v12 }
  0xd2   :  { %98 = vst.msk [vmem:[%s182_s4 + $0x8] sm:$0xff] %vm48_vm1, %v96_v14 }

// kernel: gpt_forward.11
= control target key start
LH: loop header
LB: loop body
LE: loop exit
PB: predicated region body
PF: predicated region fallthrough
CT: control target
= control target key end

     0   :  { %vm25_vm0 = vcmask 261120   ;;  %v181_v14 = vmov 0.0   ;;  %vm182_vm1 = vmmov 0   ;;  %vm145_vm2 = vcmask 781312   ;;  %s245_s0 = inlined_call_operand.vmem [shape: f32[16,32], index: 0, kind: input, shape index: {}]   ;;  %s246_s3 = inlined_call_operand.vmem [shape: bf16[32,96], index: 3, kind: input, shape index: {}]   ;;  %s247_s1 = inlined_call_operand.vmem [shape: f32[1,32], index: 1, kind: input, shape index: {}]   ;;  %s248_s2 = inlined_call_operand.vmem [shape: f32[1,32], index: 2, kind: input, shape index: {}]   ;;  %s249_s4 = inlined_call_operand.vmem [shape: f32[1,96], index: 4, kind: input, shape index: {}]   ;;  %s250_s5 = inlined_call_operand.vmem [shape: bf16[16,96], index: 5, kind: output, shape index: {}]  }
   0x1   :  { %v21_v0 = vld [vmem:[%s245_s0] sm:$0xff]  ;;  %v22_v1 = vld [vmem:[%s245_s0 + $0x8] sm:$0xff]  ;;  %165 = vmatprep.subr.bf16.mxu0 %v181_v14  ;;  %169 = vmatprep.mubr.msk.bf16.mxu0 %vm182_vm1, %v181_v14 }
   0x2   :  { %v26_v2 = vsel %vm25_vm0, %v21_v0, 0.0  ;;  %v29_v3 = vsel %vm25_vm0, %v22_v1, 0.0  ;;  %v175_v15 = vld [vmem:[%s246_s3 + $0x8] sm:$0xff]   ;;  %v176_v16 = vld [vmem:[%s246_s3] sm:$0xff]  }
   0x3   :  { %27 = vadd.xlane.f32.xlu0 %v26_v2  ;;  %166 = vmatpush3.bf16.msra.mxu0 %v175_v15  ;;  %v152_v25 = vld [vmem:[%s247_s1] ss:$0 sm:$0xff] }
   0x4   :  { %167 = vmatprep.subr.bf16.mxu0 %v181_v14  ;;  %v153_v29 = vld [vmem:[%s248_s2] ss:$0 sm:$0xff] }
   0x5   :  { %v154_v34 = vld [vmem:[%s249_s4] ss:$0 sm:$0xff] }
   0x7   :  { %30 = vadd.xlane.f32.xlu0 %v29_v3  ;;  %168 = vmatpush3.bf16.msra.mxu0 %v176_v16 }
  0x8c   :  { %v28_v4 = vpop.xlane.xlu0 %27 }
  0x8d   :  { %v33_v5 = vmul.f32 0.03125, %v28_v4 }
  0x8f   :  { %v35_v6 = vsub.f32 %v21_v0, %v33_v5 }
  0x90   :  { %v31_v7 = vpop.xlane.xlu0 %30 }
  0x91   :  { %v34_v8 = vmul.f32 0.03125, %v31_v7  ;;  %v37_v9 = vmul.f32 %v35_v6, %v35_v6 }
  0x93   :  { %v36_v10 = vsub.f32 %v22_v1, %v34_v8  ;;  %v39_v11 = vsel %vm25_vm0, %v37_v9, 0.0 }
  0x94   :  { %40 = vadd.xlane.f32.xlu1 %v39_v11 }
  0x95   :  { %v38_v12 = vmul.f32 %v36_v10, %v36_v10 }
  0x97   :  { %v42_v13 = vsel %vm25_vm0, %v38_v12, 0.0 }
  0x98   :  { %43 = vadd.xlane.f32.xlu1 %v42_v13 }
 0x11d   :  { %v41_v17 = vpop.xlane.xlu1 %40 }
 0x11e   :  { %v45_v18 = vmul.f32 0.03125, %v41_v17 }
 0x120   :  { %v47_v19 = vadd.f32 1e-05, %v45_v18 }
 0x121   :  { %v44_v20 = vpop.xlane.xlu1 %43 }
 0x122   :  { %177 = vrsqrt.f32 %v47_v19  ;;  %v46_v21 = vmul.f32 0.03125, %v44_v20 }
 0x124   :  { %v48_v22 = vadd.f32 1e-05, %v46_v21 }
 0x126   :  { %179 = vrsqrt.f32 %v48_v22 }
 0x12f   :  { %v178_v23 = vpop.eup %177 }
 0x130   :  { %v51_v24 = vmul.f32 %v178_v23, %v35_v6 }
 0x132   :  { %v59_v28 = vmul.f32 %v152_v25, %v51_v24 }
 0x133   :  { %v180_v26 = vpop.eup %179 }
 0x134   :  { %v52_v27 = vmul.f32 %v180_v26, %v36_v10  ;;  %v67_v31 = vadd.f32 %v153_v29, %v59_v28 }
 0x136   :  { %v60_v30 = vmul.f32 %v152_v25, %v52_v27 }
 0x138   :  { %v68_v32 = vadd.f32 %v153_v29, %v60_v30 }
 0x13a   :  { %v69_v33 = vpack.c.bf16 %v68_v32, %v67_v31 }
 0x13c   :  { %170 = vmatmul.mubr.msk.bf16.vlgmr.msra.gmra.mxu0 %vm25_vm0, %v69_v33 }
 0x1fc   :  { %v130_v35 = vpop.f32.mrf.mxu0 }
 0x1fd   :  { %v131_v36 = vadd.f32 %v154_v34, %v130_v35 }
 0x1fe   :  { %v171_v37 = vpop.f32.mrf.mxu0 }
 0x1ff   :  { %v160_v38 = vpack.c.bf16 %v131_v36, %v131_v36 }
 0x200   :  { %v133_v39 = vpop.f32.mrf.mxu0 }
 0x201   :  { %146 = vst.msk [vmem:[%s250_s5] sm:$0xf] %vm145_vm2, %v160_v38  ;;  %v134_v40 = vadd.f32 %v154_v34, %v133_v39 }
 0x202   :  { %v172_v41 = vpop.f32.mrf.mxu0 }
 0x203   :  { %v161_v42 = vpack.c.bf16 %v134_v40, %v134_v40 }
 0x205   :  { %147 = vst.msk [vmem:[%s250_s5 + $0x4] sm:$0xf] %vm145_vm2, %v161_v42 }

// kernel: gpt_forward.15
= control target key start
LH: loop header
LB: loop body
LE: loop exit
PB: predicated region body
PF: predicated region fallthrough
CT: control target
= control target key end

     0   :  { %v199_v0 = vmov 0.0   ;;  %vm200_vm0 = vmmov 0   ;;  %vm142_vm1 = vcmask 261120   ;;  %s268_s1 = inlined_call_operand.vmem [shape: bf16[128,32], index: 1, kind: input, shape index: {}]   ;;  %s269_s0 = inlined_call_operand.vmem [shape: bf16[16,128], index: 0, kind: input, shape index: {}]   ;;  %s270_s2 = inlined_call_operand.vmem [shape: f32[1,32], index: 2, kind: input, shape index: {}]   ;;  %s271_s3 = inlined_call_operand.vmem [shape: f32[16,32], index: 3, kind: input, shape index: {}, may-alias: {3,4}]   ;;  %s272_s4 = inlined_call_operand.vmem [shape: f32[16,32], index: 4, kind: output, shape index: {}, may-alias: {3,4}]  }
   0x1   :  { %168 = vmatprep.subr.bf16.mxu0 %v199_v0  ;;  %v190_v1 = vld [vmem:[%s268_s1 + $0x38] sm:$0xff]   ;;  %184 = vmatprep.mubr.msk.bf16.mxu0 %vm200_vm0, %v199_v0  ;;  %v191_v2 = vld [vmem:[%s268_s1 + $0x30] sm:$0xff]   ;;  %v192_v3 = vld [vmem:[%s268_s1 + $0x28] sm:$0xff]  }
   0x2   :  { %169 = vmatpush3.bf16.msra.mxu0 %v190_v1  ;;  %v193_v4 = vld [vmem:[%s268_s1 + $0x20] sm:$0xff]   ;;  %v194_v5 = vld [vmem:[%s268_s1 + $0x18] sm:$0xff]   ;;  %v195_v6 = vld [vmem:[%s268_s1 + $0x10] sm:$0xff]  }
   0x3   :  { %170 = vmatprep.subr.bf16.mxu0 %v199_v0  ;;  %v196_v7 = vld [vmem:[%s268_s1 + $0x8] sm:$0xff]   ;;  %v197_v8 = vld [vmem:[%s268_s1] sm:$0xff]  }
   0x4   :  { %v198_v9 = vld [vmem:[%s269_s0] sm:$0xff]   ;;  %v139_v17 = vld [vmem:[%s271_s3 + $0x8] sm:$0xff] }
   0x5   :  { %v149_v10 = vld [vmem:[%s270_s2] ss:$0 sm:$0xff] }
   0x6   :  { %171 = vmatpush3.bf16.msra.mxu0 %v191_v2  ;;  %v138_v12 = vld [vmem:[%s271_s3] sm:$0xff] }
   0x7   :  { %172 = vmatprep.subr.bf16.mxu0 %v199_v0 }
   0xa   :  { %173 = vmatpush3.bf16.msra.mxu0 %v192_v3 }
   0xb   :  { %174 = vmatprep.subr.bf16.mxu0 %v199_v0 }
   0xe   :  { %175 = vmatpush3.bf16.msra.mxu0 %v193_v4 }
   0xf   :  { %176 = vmatprep.subr.bf16.mxu0 %v199_v0 }
  0x12   :  { %177 = vmatpush3.bf16.msra.mxu0 %v194_v5 }
  0x13   :  { %178 = vmatprep.subr.bf16.mxu0 %v199_v0 }
  0x16   :  { %179 = vmatpush3.bf16.msra.mxu0 %v195_v6 }
  0x17   :  { %180 = vmatprep.subr.bf16.mxu0 %v199_v0 }
  0x1a   :  { %181 = vmatpush3.bf16.msra.mxu0 %v196_v7 }
  0x1b   :  { %182 = vmatprep.subr.bf16.mxu0 %v199_v0 }
  0x1e   :  { %183 = vmatpush3.bf16.msra.mxu0 %v197_v8 }
  0x21   :  { %185 = vmatmul.mubr.bf16.vlgmr.msra.gmra.mxu0 %v198_v9 }
  0xe1   :  { %v131_v11 = vpop.f32.mrf.mxu0 }
  0xe2   :  { %v132_v13 = vadd.f32 %v149_v10, %v131_v11 }
  0xe3   :  { %v186_v14 = vpop.f32.mrf.mxu0 }
  0xe4   :  { %v140_v15 = vadd.f32 %v138_v12, %v132_v13 }
  0xe5   :  { %v134_v16 = vpop.f32.mrf.mxu0 }
  0xe6   :  { %143 = vst.msk [vmem:[%s272_s4] sm:$0xff] %vm142_vm1, %v140_v15  ;;  %v135_v18 = vadd.f32 %v149_v10, %v134_v16 }
  0xe7   :  { %v187_v19 = vpop.f32.mrf.mxu0 }
  0xe8   :  { %v141_v20 = vadd.f32 %v139_v17, %v135_v18 }
  0xea   :  { %144 = vst.msk [vmem:[%s272_s4 + $0x8] sm:$0xff] %vm142_vm1, %v141_v20 }

// kernel: gpt_forward.14
= control target key start
LH: loop header
LB: loop body
LE: loop exit
PB: predicated region body
PF: predicated region fallthrough
CT: control target
= control target key end

     0   :  { %vm25_vm0 = vcmask 261120   ;;  %v207_v14 = vmov 0.0   ;;  %vm208_vm1 = vmmov 0   ;;  %s268_s0 = inlined_call_operand.vmem [shape: f32[16,32], index: 0, kind: input, shape index: {}]   ;;  %s269_s3 = inlined_call_operand.vmem [shape: bf16[32,128], index: 3, kind: input, shape index: {}]   ;;  %s270_s1 = inlined_call_operand.vmem [shape: f32[1,32], index: 1, kind: input, shape index: {}]   ;;  %s271_s2 = inlined_call_operand.vmem [shape: f32[1,32], index: 2, kind: input, shape index: {}]   ;;  %s272_s4 = inlined_call_operand.vmem [shape: f32[1,128], index: 4, kind: input, shape index: {}]   ;;  %s273_s5 = inlined_call_operand.vmem [shape: bf16[16,128], index: 5, kind: output, shape index: {}]  }
   0x1   :  { %v21_v0 = vld [vmem:[%s268_s0] sm:$0xff]  ;;  %v22_v1 = vld [vmem:[%s268_s0 + $0x8] sm:$0xff]  ;;  %187 = vmatprep.subr.bf16.mxu0 %v207_v14  ;;  %191 = vmatprep.mubr.msk.bf16.mxu0 %vm208_vm1, %v207_v14 }
   0x2   :  { %v26_v2 = vsel %vm25_vm0, %v21_v0, 0.0  ;;  %v29_v3 = vsel %vm25_vm0, %v22_v1, 0.0  ;;  %v197_v15 = vld [vmem:[%s269_s3 + $0x8] sm:$0xff]   ;;  %v198_v16 = vld [vmem:[%s269_s3] sm:$0xff]  }
   0x3   :  { %27 = vadd.xlane.f32.xlu0 %v26_v2  ;;  %188 = vmatpush3.bf16.msra.mxu0 %v197_v15  ;;  %v169_v25 = vld [vmem:[%s270_s1] ss:$0 sm:$0xff] }
   0x4   :  { %189 = vmatprep.subr.bf16.mxu0 %v207_v14  ;;  %v170_v29 = vld [vmem:[%s271_s2] ss:$0 sm:$0xff] }
   0x5   :  { %v171_v34 = vld [vmem:[%s272_s4] ss:$0 sm:$0xff] }
   0x7   :  { %30 = vadd.xlane.f32.xlu0 %v29_v3  ;;  %190 = vmatpush3.bf16.msra.mxu0 %v198_v16 }
  0x8c   :  { %v28_v4 = vpop.xlane.xlu0 %27 }
  0x8d   :  { %v33_v5 = vmul.f32 0.03125, %v28_v4 }
  0x8f   :  { %v35_v6 = vsub.f32 %v21_v0, %v33_v5 }
  0x90   :  { %v31_v7 = vpop.xlane.xlu0 %30 }
  0x91   :  { %v34_v8 = vmul.f32 0.03125, %v31_v7  ;;  %v37_v9 = vmul.f32 %v35_v6, %v35_v6 }
  0x93   :  { %v36_v10 = vsub.f32 %v22_v1, %v34_v8  ;;  %v39_v11 = vsel %vm25_vm0, %v37_v9, 0.0 }
  0x94   :  { %40 = vadd.xlane.f32.xlu1 %v39_v11 }
  0x95   :  { %v38_v12 = vmul.f32 %v36_v10, %v36_v10 }
  0x97   :  { %v42_v13 = vsel %vm25_vm0, %v38_v12, 0.0 }
  0x98   :  { %43 = vadd.xlane.f32.xlu1 %v42_v13 }
 0x11d   :  { %v41_v17 = vpop.xlane.xlu1 %40 }
 0x11e   :  { %v45_v18 = vmul.f32 0.03125, %v41_v17 }
 0x120   :  { %v47_v19 = vadd.f32 1e-05, %v45_v18 }
 0x121   :  { %v44_v20 = vpop.xlane.xlu1 %43 }
 0x122   :  { %199 = vrsqrt.f32 %v47_v19  ;;  %v46_v21 = vmul.f32 0.03125, %v44_v20 }
 0x124   :  { %v48_v22 = vadd.f32 1e-05, %v46_v21 }
 0x126   :  { %201 = vrsqrt.f32 %v48_v22 }
 0x12f   :  { %v200_v23 = vpop.eup %199 }
 0x130   :  { %v51_v24 = vmul.f32 %v200_v23, %v35_v6 }
 0x132   :  { %v59_v28 = vmul.f32 %v169_v25, %v51_v24 }
 0x133   :  { %v202_v26 = vpop.eup %201 }
 0x134   :  { %v52_v27 = vmul.f32 %v202_v26, %v36_v10  ;;  %v67_v31 = vadd.f32 %v170_v29, %v59_v28 }
 0x136   :  { %v60_v30 = vmul.f32 %v169_v25, %v52_v27 }
 0x138   :  { %v68_v32 = vadd.f32 %v170_v29, %v60_v30 }
 0x13a   :  { %v69_v33 = vpack.c.bf16 %v68_v32, %v67_v31 }
 0x13c   :  { %192 = vmatmul.mubr.msk.bf16.vlgmr.msra.gmra.mxu0 %vm25_vm0, %v69_v33 }
 0x1fc   :  { %v130_v35 = vpop.f32.mrf.mxu0 }
 0x1fd   :  { %v131_v36 = vadd.f32 %v171_v34, %v130_v35 }
 0x1fe   :  { %v193_v37 = vpop.f32.mrf.mxu0 }
 0x1ff   :  { %v139_v38 = vmul.f32 0.044715, %v131_v36  ;;  %v137_v54 = vmul.f32 0.5, %v131_v36 }
 0x200   :  { %v133_v39 = vpop.f32.mrf.mxu0 }
 0x201   :  { %v141_v40 = vmul.f32 %v139_v38, %v131_v36  ;;  %v134_v41 = vadd.f32 %v171_v34, %v133_v39 }
 0x202   :  { %v194_v42 = vpop.f32.mrf.mxu0 }
 0x203   :  { %v143_v43 = vmul.f32 %v141_v40, %v131_v36  ;;  %v140_v44 = vmul.f32 0.044715, %v134_v41  ;;  %v138_v55 = vmul.f32 0.5, %v134_v41 }
 0x205   :  { %v145_v45 = vadd.f32 %v143_v43, %v131_v36  ;;  %v142_v46 = vmul.f32 %v140_v44, %v134_v41 }
 0x207   :  { %v147_v47 = vmul.f32 0.7978846, %v145_v45  ;;  %v144_v48 = vmul.f32 %v142_v46, %v134_v41 }
 0x209   :  { %203 = vtanh.f32 %v147_v47  ;;  %v146_v49 = vadd.f32 %v144_v48, %v134_v41 }
 0x20b   :  { %v148_v50 = vmul.f32 0.7978846, %v146_v49 }
 0x20d   :  { %205 = vtanh.f32 %v148_v50 }
 0x216   :  { %v204_v51 = vpop.eup %203 }
 0x217   :  { %v151_v52 = vadd.f32 1.0, %v204_v51 }
 0x219   :  { %v153_v57 = vmul.f32 %v151_v52, %v137_v54 }
 0x21a   :  { %v206_v53 = vpop.eup %205 }
 0x21b   :  { %v152_v56 = vadd.f32 1.0, %v206_v53 }
 0x21d   :  { %v154_v58 = vmul.f32 %v152_v56, %v138_v55 }
 0x21f   :  { %v182_v59 = vpack.c.bf16 %v154_v58, %v153_v57 }
 0x221   :  { %183 = vst [vmem:[%s273_s5] sm:$0xff] %v182_v59  }

// kernel: gpt_forward.21
= control target key start
LH: loop header
LB: loop body
LE: loop exit
PB: predicated region body
PF: predicated region fallthrough
CT: control target
= control target key end

     0   :  { %vm31_vm0 = vcmask 261120   ;;  %v478_v16 = vmov 0   ;;  %v479_v42 = vmov -1.00025555e+30|-1.00025555e+30   ;;  %vm77_vm1 = vcmask 7168   ;;  %s655_s0 = inlined_call_operand.vmem [shape: f32[16,32], index: 0, kind: input, shape index: {}]   ;;  %s656_s3 = inlined_call_operand.vmem [shape: bf16[32,512], index: 3, kind: input, shape index: {}]   ;;  %s657_s1 = inlined_call_operand.vmem [shape: f32[1,32], index: 1, kind: input, shape index: {}]   ;;  %s658_s2 = inlined_call_operand.vmem [shape: f32[1,32], index: 2, kind: input, shape index: {}]   ;;  %s659_s5 = inlined_call_operand.vmem [shape: bf16[16,512], index: 5, kind: output, shape index: {0}]   ;;  %s660_s4 = inlined_call_operand.vmem [shape: s32[16,1], index: 4, kind: input, shape index: {}]   ;;  %s661_s6 = inlined_call_operand.vmem [shape: f32[16,1], index: 6, kind: output, shape index: {1}]  }
   0x1   :  { %v27_v0 = vld [vmem:[%s655_s0] sm:$0xff]  ;;  %v28_v1 = vld [vmem:[%s655_s0 + $0x8] sm:$0xff]  ;;  %171 = vmatprep.mubr.bf16.mxu0 %v478_v16  ;;  %214 = vmatprep.mubr.bf16.mxu1 %v478_v16  ;;  %v431_v43 = vcombine.low %v479_v42, %v479_v42  ;;  %v433_v44 = vcombine.high %v479_v42, %v479_v42  ;;  %v480_v45 = vmov -1e+30   ;;  %v481_v62 = vmov 0.0  }
   0x2   :  { %v32_v2 = vsel %vm31_vm0, %v27_v0, 0.0  ;;  %v35_v3 = vsel %vm31_vm0, %v28_v1, 0.0  ;;  %v442_v14 = vld [vmem:[%s656_s3 + $0x24] ss:$16 sps:$4 sm:$0xff]   ;;  %v444_v15 = vld [vmem:[%s656_s3 + $0x2c] ss:$16 sps:$4 sm:$0xff]   ;;  %440 = vset.pattern.permute.xlu0 %v478_v16  ;;  %441 = vset.pattern.permute.xlu1 %v478_v16 }
   0x3   :  { %33 = vadd.xlane.f32.xlu0 %v32_v2  ;;  %151 = vmatprep.subr.bf16.mxu0 %v442_v14  ;;  %v446_v17 = vld [vmem:[%s656_s3 + $0x20] ss:$16 sps:$4 sm:$0xff]   ;;  %v447_v18 = vld [vmem:[%s656_s3 + $0x28] ss:$16 sps:$4 sm:$0xff]   ;;  %v448_v19 = vld [vmem:[%s656_s3 + $0x4] ss:$16 sps:$4 sm:$0xff]  }
   0x4   :  { %194 = vmatprep.subr.bf16.mxu1 %v444_v15  ;;  %152 = vmatpush1.bf16.msra.mxu0 %v446_v17  ;;  %v450_v20 = vld [vmem:[%s656_s3 + $0xc] ss:$16 sps:$4 sm:$0xff]   ;;  %v452_v21 = vld [vmem:[%s656_s3] ss:$16 sps:$4 sm:$0xff]   ;;  %v453_v22 = vld [vmem:[%s656_s3 + $0x8] ss:$16 sps:$4 sm:$0xff]  }
   0x5   :  { %195 = vmatpush1.bf16.msra.mxu1 %v447_v18  ;;  %153 = vmatprep.subr.bf16.mxu0 %v448_v19  ;;  %v418_v30 = vld [vmem:[%s657_s1] ss:$0 sm:$0xff]  ;;  %273 = vst [vmem:[%s659_s5 + $0x8] sm:$0xff] %v431_v43  ;;  %275 = vst [vmem:[%s659_s5 + $0x18] sm:$0xff] %v433_v44 }
   0x6   :  { %196 = vmatprep.subr.bf16.mxu1 %v450_v20  ;;  %v419_v32 = vld [vmem:[%s658_s2] ss:$0 sm:$0xff]  ;;  %78 = vst.msk [vmem:[#allocation3] sm:$0xff] %vm77_vm1, %v480_v45  ;;  %79 = vst.msk [vmem:[#allocation3 + $0x8] sm:$0xff] %vm77_vm1, %v480_v45 }
   0x7   :  { %36 = vadd.xlane.f32.xlu0 %v35_v3  ;;  %80 = vst.msk [vmem:[#allocation4] sm:$0xff] %vm77_vm1, %v481_v62  ;;  %81 = vst.msk [vmem:[#allocation4 + $0x8] sm:$0xff] %vm77_vm1, %v481_v62 }
   0x8   :  { %154 = vmatpush1.bf16.msra.mxu0 %v452_v21  ;;  %82 = vst.msk [vmem:[#allocation5] sm:$0xff] %vm77_vm1, %v481_v62  ;;  %83 = vst.msk [vmem:[#allocation5 + $0x8] sm:$0xff] %vm77_vm1, %v481_v62 }
   0x9   :  { %197 = vmatpush1.bf16.msra.mxu1 %v453_v22 }
   0xd   :  { %v599_v63 = vld [vmem:[#allocation3] sm:$0xff]  ;;  %v604_v2 = vld [vmem:[#allocation3 + $0x8] sm:$0xff] }
  0x8c   :  { %v34_v4 = vpop.xlane.xlu0 %33 }
  0x8d   :  { %v39_v5 = vmul.f32 0.03125, %v34_v4 }
  0x8f   :  { %v41_v6 = vsub.f32 %v27_v0, %v39_v5 }
  0x90   :  { %v37_v7 = vpop.xlane.xlu0 %36 }
  0x91   :  { %v40_v8 = vmul.f32 0.03125, %v37_v7  ;;  %v43_v9 = vmul.f32 %v41_v6, %v41_v6  ;;  %v353_v7 = vld [vmem:[%s660_s4] sm:$0xff] }
  0x93   :  { %v42_v10 = vsub.f32 %v28_v1, %v40_v8  ;;  %v45_v11 = vsel %vm31_vm0, %v43_v9, 0.0  ;;  %v354_v8 = vld [vmem:[%s660_s4 + $0x8] sm:$0xff] }
  0x94   :  { %46 = vadd.xlane.f32.xlu1 %v45_v11 }
  0x95   :  { %v44_v12 = vmul.f32 %v42_v10, %v42_v10 }
  0x97   :  { %v48_v13 = vsel %vm31_vm0, %v44_v12, 0.0 }
  0x98   :  { %49 = vadd.xlane.f32.xlu1 %v48_v13 }
 0x11d   :  { %v47_v23 = vpop.xlane.xlu1 %46 }
 0x11e   :  { %v51_v24 = vmul.f32 0.03125, %v47_v23 }
 0x120   :  { %v53_v25 = vadd.f32 1e-05, %v51_v24 }
 0x121   :  { %v50_v26 = vpop.xlane.xlu1 %49 }
 0x122   :  { %454 = vrsqrt.f32 %v53_v25  ;;  %v52_v27 = vmul.f32 0.03125, %v50_v26 }
 0x124   :  { %v54_v28 = vadd.f32 1e-05, %v52_v27 }
 0x126   :  { %456 = vrsqrt.f32 %v54_v28 }
 0x12f   :  { %v455_v29 = vpop.eup %454 }
 0x130   :  { %v57_v31 = vmul.f32 %v455_v29, %v41_v6 }
 0x132   :  { %v65_v33 = vmul.f32 %v418_v30, %v57_v31 }
 0x133   :  { %v457_v34 = vpop.eup %456 }
 0x134   :  { %v73_v35 = vadd.f32 %v419_v32, %v65_v33  ;;  %v58_v36 = vmul.f32 %v457_v34, %v42_v10  ;;  %v225_v10 = vlaneseq }
 0x136   :  { %75 = vst.msk [vmem:[#allocation2] sm:$0xff] %vm31_vm0, %v73_v35  ;;  %v66_v37 = vmul.f32 %v418_v30, %v58_v36  ;;  %v226_v18 = vand.u32 127, %v225_v10  ;;  %v352_v10 = vld [vmem:[#allocation5 + $0x8] sm:$0xff] }
 0x138   :  { %v74_v38 = vadd.f32 %v419_v32, %v66_v37  ;;  %v227_v25 = vadd.s32 128, %v226_v18  ;;  %v228_v28 = vadd.s32 256, %v226_v18  ;;  %v229_v33 = vadd.s32 384, %v226_v18 }
 0x13a   :  { %76 = vst.msk [vmem:[#allocation2 + $0x8] sm:$0xff] %vm31_vm0, %v74_v38 }
 0x13d   :  { %v92_v39 = vld [vmem:[#allocation2] sm:$0xff] }
 0x141   :  { %v93_v40 = vld [vmem:[#allocation2 + $0x8] sm:$0xff] }
 0x142   :  { %v94_v41 = vpack.c.bf16 %v93_v40, %v92_v39 }
 0x144   :  { %428 = vmatmul.mubr.msk.bf16.vlgmr.msra.gmra.mxu0 %vm31_vm0, %v94_v41  ;;  %429 = vmatmul.mubr.msk.bf16.vlgmr.msra.gmra.mxu1 %vm31_vm0, %v94_v41 }
 0x204   :  { %v569_v46 = vpop.f32.mrf.mxu0  ;;  %v216_v47 = vpop.f32.mrf.mxu1 }
 0x205   :  { %v278_v51 = vmax.f32 %v569_v46, -1e+30 }
 0x206   :  { %v571_v48 = vpop.f32.mrf.mxu0  ;;  %v218_v49 = vpop.f32.mrf.mxu1 }
 0x207   :  { %v434_v50 = vpack.c.bf16 %v571_v48, %v569_v46  ;;  %v279_v52 = vmax.f32 %v571_v48, -1e+30 }
 0x208   :  { %v577_v53 = vpop.f32.mrf.mxu0  ;;  %v220_v54 = vpop.f32.mrf.mxu1 }
 0x209   :  { %272 = vst [vmem:[%s659_s5] sm:$0xff] %v434_v50  ;;  %v280_v55 = vmax.f32 %v278_v51, %v279_v52  ;;  %v283_v59 = vmax.f32 %v577_v53, -1e+30 }
 0x20a   :  { %v582_v56 = vpop.f32.mrf.mxu0  ;;  %v222_v57 = vpop.f32.mrf.mxu1 }
 0x20b   :  { %v435_v58 = vpack.c.bf16 %v582_v56, %v577_v53  ;;  %281 = vmax.xlane.f32.xlu0 %v280_v55  ;;  %v284_v60 = vmax.f32 %v582_v56, -1e+30 }
 0x20d   :  { %274 = vst [vmem:[%s659_s5 + $0x10] sm:$0xff] %v435_v58  ;;  %v285_v61 = vmax.f32 %v283_v59, %v284_v60  ;;  %v296_v59 = vld [vmem:[#allocation4] sm:$0xff] }
 0x20f   :  { %286 = vmax.xlane.f32.xlu1 %v285_v61 }
 0x294   :  { %v282_v0 = vpop.xlane.xlu0 %281 }
 0x295   :  { %v602_v1 = vmax.f32 %v599_v63, %v282_v0 }
 0x297   :  { %v290_v3 = vsub.f32 %v599_v63, %v602_v1  ;;  %349 = vst.msk [vmem:[#allocation3] sm:$0xff] %vm77_vm1, %v602_v1  ;;  %302 = vperm.xlu0 %440, %v602_v1  }
 0x298   :  { %v287_v4 = vpop.xlane.xlu1 %286 }
 0x299   :  { %v612_v5 = vmax.f32 %v604_v2, %v287_v4  ;;  %v297_v4 = vld [vmem:[#allocation4 + $0x8] sm:$0xff] }
 0x29b   :  { %v291_v6 = vsub.f32 %v604_v2, %v612_v5  ;;  %350 = vst.msk [vmem:[#allocation3 + $0x8] sm:$0xff] %vm77_vm1, %v612_v5  ;;  %307 = vperm.xlu1 %441, %v612_v5  }
 0x29d   :  { %v294_v57 = vmul.f32 1.442695, %v291_v6 }
 0x29f   :  { %356 = vperm.xlu1 %441, %v353_v7  }
 0x2a3   :  { %359 = vperm.xlu1 %441, %v354_v8  }
 0x312   :  { %v303_v9 = vpop.permute.xlu0 %302 }
 0x313   :  { %v310_v11 = vsub.f32 %v569_v46, %v303_v9  ;;  %v311_v12 = vsub.f32 %v571_v48, %v303_v9  ;;  %v312_v13 = vsub.f32 -1e+30, %v303_v9 }
 0x315   :  { %v318_v14 = vmul.f32 1.442695, %v310_v11  ;;  %v320_v15 = vmul.f32 1.442695, %v311_v12  ;;  %v322_v16 = vmul.f32 1.442695, %v312_v13 }
 0x316   :  { %v308_v17 = vpop.permute.xlu1 %307 }
 0x317   :  { %458 = vpow2.f32 %v318_v14  ;;  %v314_v19 = vsub.f32 %v577_v53, %v308_v17  ;;  %v315_v20 = vsub.f32 %v582_v56, %v308_v17  ;;  %v316_v21 = vsub.f32 -1e+30, %v308_v17  ;;  %v394_v14 = vld [vmem:[#allocation3] sm:$0xff] }
 0x318   :  { %460 = vpow2.f32 %v320_v15 }
 0x319   :  { %v326_v22 = vmul.f32 1.442695, %v314_v19  ;;  %v328_v23 = vmul.f32 1.442695, %v315_v20  ;;  %462 = vpow2.f32 %v322_v16  ;;  %v330_v24 = vmul.f32 1.442695, %v316_v21 }
 0x31a   :  { %v357_v26 = vpop.permute.xlu1 %356  ;;  %v395_v20 = vld [vmem:[#allocation3 + $0x8] sm:$0xff] }
 0x31b   :  { %464 = vpow2.f32 %v326_v22  ;;  %vm361_vm2 = vcmp.eq.s32.totalorder %v226_v18, %v357_v26  ;;  %vm362_vm3 = vcmp.eq.s32.totalorder %v227_v25, %v357_v26  ;;  %vm363_vm6 = vcmp.eq.s32.totalorder %v228_v28, %v357_v26 }
 0x31c   :  { %466 = vpow2.f32 %v328_v23  ;;  %v369_v29 = vsel %vm361_vm2, %v569_v46, 0.0  ;;  %v370_v30 = vsel %vm362_vm3, %v571_v48, 0.0  ;;  %v371_v41 = vsel %vm363_vm6, -1e+30, %v481_v62 }
 0x31d   :  { %468 = vpow2.f32 %v330_v24  ;;  %v377_v34 = vadd.f32 %v370_v30, %v369_v29  ;;  %vm364_vm7 = vcmp.eq.s32.totalorder %v229_v33, %v357_v26 }
 0x31e   :  { %v360_v27 = vpop.permute.xlu1 %359  ;;  %v372_v49 = vsel %vm364_vm7, -1e+30, %v481_v62 }
 0x31f   :  { %vm365_vm4 = vcmp.eq.s32.totalorder %v226_v18, %v360_v27  ;;  %vm366_vm5 = vcmp.eq.s32.totalorder %v227_v25, %v360_v27  ;;  %v378_v43 = vadd.f32 %v377_v34, %v371_v41  ;;  %vm367_vm8 = vcmp.eq.s32.totalorder %v228_v28, %v360_v27 }
 0x320   :  { %v373_v37 = vsel %vm365_vm4, %v577_v53, 0.0  ;;  %v374_v38 = vsel %vm366_vm5, %v582_v56, 0.0  ;;  %v375_v50 = vsel %vm367_vm8, -1e+30, %v481_v62  ;;  %vm368_vm9 = vcmp.eq.s32.totalorder %v229_v33, %v360_v27 }
 0x321   :  { %v382_v46 = vadd.f32 %v374_v38, %v373_v37  ;;  %v379_v52 = vadd.f32 %v378_v43, %v372_v49  ;;  %v376_v54 = vsel %vm368_vm9, -1e+30, %v481_v62  ;;  %v292_v56 = vmul.f32 1.442695, %v290_v3  ;;  %v351_v62 = vld [vmem:[#allocation5] sm:$0xff] }
 0x323   :  { %v383_v53 = vadd.f32 %v382_v46, %v375_v50  ;;  %470 = vpow2.f32 %v292_v56 }
 0x324   :  { %v459_v31 = vpop.eup %458  ;;  %472 = vpow2.f32 %v294_v57 }
 0x325   :  { %v461_v32 = vpop.eup %460  ;;  %v384_v55 = vadd.f32 %v383_v53, %v376_v54 }
 0x326   :  { %v334_v35 = vadd.f32 %v461_v32, %v459_v31  ;;  %v463_v36 = vpop.eup %462 }
 0x328   :  { %v465_v39 = vpop.eup %464  ;;  %v335_v40 = vadd.f32 %v463_v36, %v334_v35 }
 0x329   :  { %v467_v42 = vpop.eup %466 }
 0x32a   :  { %v336_v44 = vadd.f32 %v463_v36, %v335_v40  ;;  %v339_v45 = vadd.f32 %v467_v42, %v465_v39  ;;  %v469_v47 = vpop.eup %468 }
 0x32c   :  { %337 = vadd.xlane.f32.xlu1 %v336_v44  ;;  %v340_v48 = vadd.f32 %v469_v47, %v339_v45 }
 0x32e   :  { %v341_v51 = vadd.f32 %v469_v47, %v340_v48 }
 0x330   :  { %342 = vadd.xlane.f32.xlu0 %v341_v51  ;;  %380 = vadd.xlane.f32.xlu1 %v379_v52  ;;  %v471_v58 = vpop.eup %470 }
 0x331   :  { %v298_v60 = vmul.f32 %v471_v58, %v296_v59  ;;  %v473_v61 = vpop.eup %472 }
 0x332   :  { %v299_v8 = vmul.f32 %v473_v61, %v297_v4 }
 0x334   :  { %385 = vadd.xlane.f32.xlu1 %v384_v55 }
 0x3b5   :  { %v338_v0 = vpop.xlane.xlu1 %337 }
 0x3b6   :  { %v344_v7 = vadd.f32 %v338_v0, %v298_v60 }
 0x3b8   :  { %347 = vst.msk [vmem:[#allocation4] sm:$0xff] %vm77_vm1, %v344_v7 }
 0x3b9   :  { %v343_v9 = vpop.xlane.xlu0 %342  ;;  %v381_v63 = vpop.xlane.xlu1 %380 }
 0x3ba   :  { %v345_v1 = vadd.f32 %v343_v9, %v299_v8  ;;  %v387_v3 = vadd.f32 %v381_v63, %v351_v62 }
 0x3bc   :  { %348 = vst.msk [vmem:[#allocation4 + $0x8] sm:$0xff] %vm77_vm1, %v345_v1  ;;  %389 = vst.msk [vmem:[#allocation5] sm:$0xff] %vm77_vm1, %v387_v3 }
 0x3bd   :  { %v386_v2 = vpop.xlane.xlu1 %385 }
 0x3be   :  { %v388_v5 = vadd.f32 %v386_v2, %v352_v10 }
 0x3bf   :  { %v396_v6 = vld [vmem:[#allocation4] sm:$0xff] }
 0x3c0   :  { %474 = vlog2.f32 %v396_v6  ;;  %390 = vst.msk [vmem:[#allocation5 + $0x8] sm:$0xff] %vm77_vm1, %v388_v5 }
 0x3c3   :  { %v397_v11 = vld [vmem:[#allocation4 + $0x8] sm:$0xff]  ;;  %v404_v17 = vld [vmem:[#allocation5] sm:$0xff] }
 0x3c4   :  { %476 = vlog2.f32 %v397_v11 }
 0x3c7   :  { %v405_v22 = vld [vmem:[#allocation5 + $0x8] sm:$0xff] }
 0x3cd   :  { %v475_v12 = vpop.eup %474 }
 0x3ce   :  { %v399_v13 = vmul.f32 0.6931472, %v475_v12 }
 0x3d0   :  { %v402_v15 = vadd.f32 %v399_v13, %v394_v14 }
 0x3d1   :  { %v477_v16 = vpop.eup %476 }
 0x3d2   :  { %v406_v18 = vsub.f32 %v402_v15, %v404_v17  ;;  %v401_v19 = vmul.f32 0.6931472, %v477_v16 }
 0x3d4   :  { %408 = vst.msk [vmem:[%s661_s6] sm:$0xff] %vm77_vm1, %v406_v18  ;;  %v403_v21 = vadd.f32 %v401_v19, %v395_v20 }
 0x3d6   :  { %v407_v23 = vsub.f32 %v403_v21, %v405_v22 }
 0x3d8   :  { %409 = vst.msk [vmem:[%s661_s6 + $0x8] sm:$0xff] %vm77_vm1, %v407_v23 }

// kernel: gpt_forward.12
= control target key start
LH: loop header
LB: loop body
LE: loop exit
PB: predicated region body
PF: predicated region fallthrough
CT: control target
= control target key end

     0   :  { %s2123_s12 = smov 0   ;;  %s2125_s13 = smov 0   ;;  %s2430_s0 = inlined_call_operand.vmem [shape: bf16[2,8,32], index: 0, kind: input, shape index: {}]   ;;  %s2431_s1 = inlined_call_operand.vmem [shape: bf16[2,8,32], index: 1, kind: input, shape index: {}]   ;;  %s2432_s2 = inlined_call_operand.vmem [shape: bf16[2,8,32], index: 2, kind: input, shape index: {}]   ;;  %s2433_s3 = inlined_call_operand.vmem [shape: bf16[2,8,32], index: 3, kind: output, shape index: {}]  }
   0x1   :  { %s2127_s14 = smov 0  }
   0x2 LB: > { %s32_s15 = sadd.s32 1, %s2085_s13  ;;  %p1920_p0 = scmp.ge.s32.totalorder %s2089_s14, 1  ;;  %s2089_s14 = sphi %s2127_s14, %s13_s14   ;;  %s2085_s13 = sphi %s2125_s13, %s2435_s13   ;;  %s2081_s12 = sphi %s2123_s12, %s2434_s12  }
   0x3   : > { %p34_p1 = scmp.ge.s32.totalorder %s32_s15, 2  ;;  %p190_p2 = scmp.lt.s32.totalorder %s2089_s14, 3 }
   0x5   : > { %s2437_s15 = smov (%p34_p1, %s32_s15), 0  ;;  %p191_p3 = pnand %p1920_p0, %p190_p2 }
   0x6   : > { %p232_p4 = scmp.lt.s32.totalorder (!%p191_p3), %s2081_s12, 1  ;;  %s2091_s20 = smov (!%p191_p3), 120  }
   0x7   : > { %194 = sbr.rel (%p191_p3) target bundleno = 1312 (0x520), region = 32  ;;  %s2092_s21 = smov (!%p191_p3), 104  }
   0x8   : > { %s2093_s22 = smov (!%p191_p3), 112   ;;  %s2100_s29 = smov (!%p191_p3), 16  }
   0x9   : > { %s2101_s30 = smov (!%p191_p3), 8   ;;  %s2102_s4 = smov (!%p191_p3), 24  }
   0xc   : > { %s2439_s12 = smov (!%p232_p4, %s2081_s12), 1  ;;  %v2094_v1 = vmov 1983009808   ;;  %v307_v3 = vlaneseq  ;;  %v2095_v6 = vmov 1934713408   ;;  %v2096_v34 = vmov 0  }
   0xd   : > { %s2141_s16 = sshll.u32 %s2439_s12, 2  ;;  %v305_v2 = vunpack.c.l.s4 %v2094_v1  ;;  %v322_v7 = vunpack.c.l.s4 %v2095_v6  ;;  %v2097_v60 = vmov 0.0   ;;  %vm2098_vm0 = vmmov 0  }
   0xe   : > { %s245_s19 = scalar_lea.vmem %s2431_s1, %s2141_s16  ;;  %v2151_v5 = vshrl.u32 %v307_v3, 7  ;;  %s238_s25 = scalar_lea.vmem %s2430_s0, %s2141_s16  ;;  %1957 = vmatprep.subr.bf16.mxu0 %v2097_v60  ;;  %1963 = vmatprep.subr.bf16.mxu1 %v2097_v60  ;;  %vm265_vm1 = vcmask 64512   ;;  %vm1031_vm2 = vcmask 1043456   ;;  %vm270_vm3 = vcmask 7168  }
   0xf   : > { %v371_v0 = vld [vmem:[%s245_s19] sm:$0xf]  ;;  %v306_v4 = vunpack.c.0.s8 %v305_v2  ;;  %v323_v15 = vunpack.c.0.s8 %v322_v7  ;;  %1959 = vmatprep.mubr.msk.bf16.mxu0 %vm2098_vm0, %v2097_v60  ;;  %1965 = vmatprep.mubr.msk.bf16.mxu1 %vm2098_vm0, %v2097_v60  ;;  %266 = vst.msk [vmem:[#allocation2] sm:$0xff] %vm265_vm1, %v2097_v60  ;;  %267 = vst.msk [vmem:[#allocation2 + $0x8] sm:$0xff] %vm265_vm1, %v2097_v60  ;;  %s252_s28 = scalar_lea.vmem %s2432_s2, %s2141_s16  ;;  %vm1802_vm5 = vcmask 130048   ;;  %vm1804_vm6 = vcmask 195584   ;;  %s259_s7 = scalar_lea.vmem %s2433_s3, %s2141_s16 }
  0x10   : > { %373 = vrot.lane.b32.xlu0 %v371_v0, %s2091_s20  ;;  %377 = vrot.lane.b32.xlu1 %v371_v0, %s2092_s21  ;;  %v382_v10 = vshrl.u32 %v371_v0, 16  ;;  %v2175_v39 = vld [vmem:[%s238_s25] sm:$0xf]  ;;  %268 = vst.msk [vmem:[#allocation2 + $0x10] sm:$0xff] %vm265_vm1, %v2097_v60  ;;  %269 = vst.msk [vmem:[#allocation2 + $0x18] sm:$0xff] %vm265_vm1, %v2097_v60  ;;  %vm1807_vm7 = vcmask 257024  }
  0x11   : > { %v2154_v12 = vsub.s32 %v306_v4, %v2151_v5  ;;  %v2159_v23 = vsub.s32 %v323_v15, %v2151_v5  ;;  %275 = vst.msk [vmem:[#allocation4] sm:$0xff] %vm270_vm3, %v2097_v60  ;;  %276 = vst.msk [vmem:[#allocation4 + $0x8] sm:$0xff] %vm270_vm3, %v2097_v60 }
  0x12   : > { %277 = vst.msk [vmem:[#allocation4 + $0x10] sm:$0xff] %vm270_vm3, %v2097_v60  ;;  %278 = vst.msk [vmem:[#allocation4 + $0x18] sm:$0xff] %vm270_vm3, %v2097_v60 }
  0x14   : > { %375 = vrot.lane.b32.xlu0 %v371_v0, %s2093_s22 }
  0x82   : > { %v374_v8 = vpop.permute.xlu0 %373  ;;  %v378_v9 = vpop.permute.xlu1 %377 }
  0x83   : > { %v383_v11 = vshrl.u32 %v374_v8, 16  ;;  %v381_v13 = vpack.i.b16 %v374_v8, %v371_v0  ;;  %v389_v14 = vshrl.u32 %v378_v9, 16 }
  0x85   : > { %v384_v17 = vpack.i.b16 %v383_v11, %v382_v10  ;;  %v398_v20 = vrot.slane %v381_v13, %v2154_v12 }
  0x86   : > { %v376_v16 = vpop.permute.xlu0 %375 }
  0x87   : > { %v387_v18 = vpack.i.b16 %v378_v9, %v376_v16  ;;  %v388_v19 = vshrl.u32 %v376_v16, 16  ;;  %v432_v26 = vrot.slane %v384_v17, %v2154_v12 }
  0x89   : > { %v390_v21 = vpack.i.b16 %v389_v14, %v388_v19  ;;  %v406_v22 = vrot.slane %v387_v18, %v2154_v12 }
  0x8b   : > { %v408_v24 = vcombine.high %v398_v20, %v406_v22  ;;  %v407_v25 = vcombine.low %v398_v20, %v406_v22  ;;  %v440_v27 = vrot.slane %v390_v21, %v2154_v12 }
  0x8d   : > { %v422_v28 = vrot.slane %v408_v24, %v2159_v23  ;;  %v415_v29 = vrot.slane %v407_v25, %v2159_v23  ;;  %v442_v30 = vcombine.high %v432_v26, %v440_v27  ;;  %v441_v31 = vcombine.low %v432_v26, %v440_v27 }
  0x8f   : > { %673 = vxpose.xlu0.c.b16.start.end [1/1] (short) (narrow) %v422_v28, 16  ;;  %609 = vxpose.xlu1.c.b16.start.end [1/1] (short) (narrow) %v415_v29, 16  ;;  %v456_v32 = vrot.slane %v442_v30, %v2159_v23  ;;  %v449_v33 = vrot.slane %v441_v31, %v2159_v23  ;;  %v423_v35 = vcombine.high %v415_v29, %v2096_v34  ;;  %v294_v30 = vshrl.u32 %v2175_v39, 16 }
  0x90   : > { %v424_v37 = vcombine.high %v422_v28, %v2096_v34 }
  0x91   : > { %v457_v36 = vcombine.high %v449_v33, %v2096_v34  ;;  %v458_v38 = vcombine.high %v456_v32, %v2096_v34 }
  0x93   : > { %689 = vxpose.xlu1.c.b16.start.end [1/1] (short) (narrow) %v456_v32, 16  ;;  %625 = vxpose.xlu0.c.b16.start.end [1/1] (short) (narrow) %v449_v33, 16 }
  0x97   : > { %641 = vxpose.xlu0.c.b16.start.end [1/1] (short) (narrow) %v423_v35, 16  ;;  %657 = vxpose.xlu1.c.b16.start.end [1/1] (short) (narrow) %v457_v36, 16 }
  0x9b   : > { %705 = vxpose.xlu0.c.b16.start.end [1/1] (short) (narrow) %v424_v37, 16  ;;  %721 = vxpose.xlu1.c.b16.start.end [1/1] (short) (narrow) %v458_v38, 16 }
  0x9f   : > { %287 = vrot.lane.b32.xlu1 %v2175_v39, %s2093_s22 }
  0xa3   : > { %289 = vrot.lane.b32.xlu1 %v2175_v39, %s2092_s21 }
  0xa4   : > { %285 = vrot.lane.b32.xlu0 %v2175_v39, %s2091_s20 }
  0xf1   : > { %v681_v40 = vpop.trf.xlu0  ;;  %v617_v41 = vpop.trf.xlu1 }
  0xf2   : > { %v737_v46 = vcombine.low %v617_v41, %v681_v40 }
  0xf4   : > { %v744_v52 = vrot.slane %v737_v46, %v2154_v12 }
  0xf5   : > { %v697_v42 = vpop.trf.xlu1  ;;  %v633_v43 = vpop.trf.xlu0 }
  0xf6   : > { %v771_v47 = vcombine.low %v633_v43, %v697_v42 }
  0xf8   : > { %v778_v53 = vrot.slane %v771_v47, %v2154_v12 }
  0xf9   : > { %v649_v44 = vpop.trf.xlu0  ;;  %v665_v45 = vpop.trf.xlu1 }
  0xfd   : > { %v713_v48 = vpop.trf.xlu0  ;;  %v729_v49 = vpop.trf.xlu1 }
  0xfe   : > { %v745_v50 = vcombine.low %v649_v44, %v713_v48  ;;  %v779_v51 = vcombine.low %v665_v45, %v729_v49 }
 0x100   : > { %v752_v54 = vrot.slane %v745_v50, %v2154_v12  ;;  %v786_v55 = vrot.slane %v779_v51, %v2154_v12 }
 0x102   : > { %v753_v56 = vcombine.low %v744_v52, %v752_v54  ;;  %v754_v57 = vcombine.high %v744_v52, %v752_v54  ;;  %v787_v58 = vcombine.low %v778_v53, %v786_v55  ;;  %v788_v59 = vcombine.high %v778_v53, %v786_v55 }
 0x104   : > { %v761_v61 = vrot.slane %v753_v56, %v2159_v23  ;;  %v768_v62 = vrot.slane %v754_v57, %v2159_v23  ;;  %v795_v63 = vrot.slane %v787_v58, %v2159_v23  ;;  %v802_v0 = vrot.slane %v788_v59, %v2159_v23 }
 0x106   : > { %v823_v1 = vpack.i.b16 %v802_v0, %v768_v62  ;;  %v807_v2 = vpack.i.b16 %v795_v63, %v761_v61  ;;  %v809_v4 = vshrl.u32 %v761_v61, 16  ;;  %v810_v6 = vshrl.u32 %v795_v63, 16 }
 0x107   : > { %v769_v7 = vcombine.high %v761_v61, %v2096_v34  ;;  %v803_v8 = vcombine.high %v795_v63, %v2096_v34  ;;  %v770_v10 = vcombine.high %v768_v62, %v2096_v34  ;;  %v804_v11 = vcombine.high %v802_v0, %v2096_v34 }
 0x108   : > { %901 = vxpose.xlu1.c.b16.start.end [1/1] (short) (narrow) %v823_v1, 16  ;;  %837 = vxpose.xlu0.c.b16.start.end [1/1] (short) (narrow) %v807_v2, 16  ;;  %v811_v9 = vpack.i.b16 %v810_v6, %v809_v4  ;;  %v825_v14 = vshrl.u32 %v768_v62, 16  ;;  %v826_v15 = vshrl.u32 %v802_v0, 16 }
 0x109   : > { %v815_v13 = vpack.i.b16 %v803_v8, %v769_v7  ;;  %v831_v16 = vpack.i.b16 %v804_v11, %v770_v10  ;;  %v817_v18 = vshrl.u32 %v769_v7, 16  ;;  %v818_v19 = vshrl.u32 %v803_v8, 16 }
 0x10a   : > { %v827_v17 = vpack.i.b16 %v826_v15, %v825_v14  ;;  %v833_v21 = vshrl.u32 %v770_v10, 16  ;;  %v834_v22 = vshrl.u32 %v804_v11, 16 }
 0x10b   : > { %v819_v20 = vpack.i.b16 %v818_v19, %v817_v18 }
 0x10c   : > { %853 = vxpose.xlu1.c.b16.start.end [1/1] (short) (narrow) %v811_v9, 16  ;;  %869 = vxpose.xlu0.c.b16.start.end [1/1] (short) (narrow) %v815_v13, 16  ;;  %v835_v24 = vpack.i.b16 %v834_v22, %v833_v21 }
 0x110   : > { %933 = vxpose.xlu1.c.b16.start.end [1/1] (short) (narrow) %v831_v16, 16  ;;  %917 = vxpose.xlu0.c.b16.start.end [1/1] (short) (narrow) %v827_v17, 16 }
 0x111   : > { %v288_v25 = vpop.permute.xlu1 %287 }
 0x112   : > { %v300_v28 = vshrl.u32 %v288_v25, 16 }
 0x114   : > { %885 = vxpose.xlu0.c.b16.start.end [1/1] (short) (narrow) %v819_v20, 16  ;;  %2041 = vset.pattern.permute.xlu1 %v2096_v34 }
 0x115   : > { %v290_v26 = vpop.permute.xlu1 %289 }
 0x116   : > { %v286_v27 = vpop.permute.xlu0 %285  ;;  %v301_v29 = vshrl.u32 %v290_v26, 16  ;;  %v299_v32 = vpack.i.b16 %v290_v26, %v288_v25 }
 0x117   : > { %v295_v31 = vshrl.u32 %v286_v27, 16  ;;  %v293_v33 = vpack.i.b16 %v286_v27, %v2175_v39 }
 0x118   : > { %949 = vxpose.xlu0.c.b16.start.end [1/1] (short) (narrow) %v835_v24, 16  ;;  %v302_v35 = vpack.i.b16 %v301_v29, %v300_v28  ;;  %v318_v37 = vrot.slane %v299_v32, %v2154_v12 }
 0x119   : > { %v296_v36 = vpack.i.b16 %v295_v31, %v294_v30  ;;  %v310_v38 = vrot.slane %v293_v33, %v2154_v12 }
 0x11a   : > { %v352_v40 = vrot.slane %v302_v35, %v2154_v12 }
 0x11b   : > { %v344_v41 = vrot.slane %v296_v36, %v2154_v12  ;;  %v319_v44 = vcombine.low %v310_v38, %v318_v37  ;;  %v320_v45 = vcombine.high %v310_v38, %v318_v37 }
 0x11d   : > { %v353_v46 = vcombine.low %v344_v41, %v352_v40  ;;  %v354_v47 = vcombine.high %v344_v41, %v352_v40  ;;  %v327_v39 = vrot.slane %v319_v44, %v2159_v23  ;;  %v334_v50 = vrot.slane %v320_v45, %v2159_v23 }
 0x11f   : > { %v361_v51 = vrot.slane %v353_v46, %v2159_v23  ;;  %v368_v52 = vrot.slane %v354_v47, %v2159_v23  ;;  %v547_v56 = vcombine.low %v327_v39, %v334_v50  ;;  %v1925_v58 = vcombine.high %v327_v39, %v334_v50 }
 0x121   : > { %2042 = vset.pattern.permute.xlu0 %v2096_v34  ;;  %v572_v59 = vcombine.low %v361_v51, %v368_v52  ;;  %v1926_v61 = vcombine.high %v361_v51, %v368_v52  ;;  %v554_v1 = vrot.slane %v547_v56, %v2154_v12  ;;  %v562_v2 = vrot.slane %v1925_v58, %v2154_v12 }
 0x123   : > { %v579_v4 = vrot.slane %v572_v59, %v2154_v12  ;;  %v587_v6 = vrot.slane %v1926_v61, %v2154_v12  ;;  %v563_v11 = vcombine.low %v554_v1, %v562_v2 }
 0x125   : > { %v588_v14 = vcombine.low %v579_v4, %v587_v6  ;;  %v570_v18 = vrot.slane %v563_v11, %v2159_v23  ;;  %v459_v11 = vld [vmem:[%s252_s28] sm:$0xf] }
 0x127   : > { %v595_v19 = vrot.slane %v588_v14, %v2159_v23  ;;  %v600_v27 = vshrl.u32 %v570_v18, 16  ;;  %v571_v41 = vcombine.high %v570_v18, %v2096_v34 }
 0x129   : > { %v601_v28 = vshrl.u32 %v595_v19, 16  ;;  %v599_v36 = vpack.i.b16 %v595_v19, %v570_v18  ;;  %v606_v44 = vshrl.u32 %v571_v41, 16 }
 0x12b   : > { %v602_v40 = vpack.i.b16 %v601_v28, %v600_v27  ;;  %v470_v28 = vshrl.u32 %v459_v11, 16 }
 0x16a   : > { %v909_v42 = vpop.trf.xlu1  ;;  %v845_v43 = vpop.trf.xlu0 }
 0x16b   : > { %v965_v53 = vcombine.low %v845_v43, %v909_v42  ;;  %v596_v42 = vcombine.high %v595_v19, %v2096_v34 }
 0x16d   : > { %v972_v63 = vrot.slane %v965_v53, %v2154_v12  ;;  %v607_v45 = vshrl.u32 %v596_v42, 16  ;;  %v605_v46 = vpack.i.b16 %v596_v42, %v571_v41 }
 0x16e   : > { %v861_v48 = vpop.trf.xlu1  ;;  %v877_v49 = vpop.trf.xlu0 }
 0x16f   : > { %v608_v47 = vpack.i.b16 %v607_v45, %v606_v44 }
 0x172   : > { %v941_v54 = vpop.trf.xlu1  ;;  %v925_v55 = vpop.trf.xlu0 }
 0x173   : > { %v973_v57 = vcombine.low %v877_v49, %v941_v54  ;;  %v990_v8 = vcombine.low %v861_v48, %v925_v55  ;;  %v2099_v48 = vmov -1e+30   ;;  %v1219_v49 = vand.u32 127, %v307_v3 }
 0x174   : > { %271 = vst.msk [vmem:[#allocation3] sm:$0xff] %vm270_vm3, %v2099_v48  ;;  %272 = vst.msk [vmem:[#allocation3 + $0x8] sm:$0xff] %vm270_vm3, %v2099_v48 }
 0x175   : > { %v980_v62 = vrot.slane %v973_v57, %v2154_v12  ;;  %v997_v15 = vrot.slane %v990_v8, %v2154_v12  ;;  %273 = vst.msk [vmem:[#allocation3 + $0x10] sm:$0xff] %vm270_vm3, %v2099_v48  ;;  %274 = vst.msk [vmem:[#allocation3 + $0x18] sm:$0xff] %vm270_vm3, %v2099_v48  ;;  %vm1223_vm4 = vcmp.le.s32.totalorder %v1219_v49, %v2151_v5 }
 0x176   : > { %v893_v0 = vpop.trf.xlu0 }
 0x177   : > { %v981_v7 = vcombine.low %v972_v63, %v980_v62 }
 0x179   : > { %v988_v13 = vrot.slane %v981_v7, %v2159_v23 }
 0x17a   : > { %v957_v9 = vpop.trf.xlu0 }
 0x17b   : > { %v998_v10 = vcombine.low %v893_v0, %v957_v9  ;;  %v989_v20 = vcombine.high %v988_v13, %v2096_v34  ;;  %v1018_v24 = vshrl.u32 %v988_v13, 16  ;;  %v2302_v5 = vld [vmem:[#allocation3] sm:$0xff]  ;;  %v2304_v14 = vld [vmem:[#allocation3 + $0x8] sm:$0xff] }
 0x17d   : > { %v1005_v16 = vrot.slane %v998_v10, %v2154_v12  ;;  %v1024_v29 = vshrl.u32 %v989_v20, 16 }
 0x17f   : > { %v1006_v17 = vcombine.low %v997_v15, %v1005_v16 }
 0x181   : > { %v1013_v21 = vrot.slane %v1006_v17, %v2159_v23 }
 0x183   : > { %v1017_v22 = vpack.i.b16 %v1013_v21, %v988_v13  ;;  %v1019_v25 = vshrl.u32 %v1013_v21, 16  ;;  %v1014_v26 = vcombine.high %v1013_v21, %v2096_v34 }
 0x185   : > { %v1033_v30 = vsel %vm1031_vm2, %v1017_v22, 0  ;;  %v1020_v31 = vpack.i.b16 %v1019_v25, %v1018_v24  ;;  %v1023_v32 = vpack.i.b16 %v1014_v26, %v989_v20  ;;  %v1025_v33 = vshrl.u32 %v1014_v26, 16  ;;  %v2322_v20 = vld [vmem:[#allocation3 + $0x10] sm:$0xff]  ;;  %v2324_v22 = vld [vmem:[#allocation3 + $0x18] sm:$0xff] }
 0x186   : > { %1958 = vmatpush3.bf16.msra.mxu0 %v1033_v30 }
 0x187   : > { %v1079_v35 = vsel %vm1031_vm2, %v1020_v31, 0  ;;  %1969 = vmatprep.subr.bf16.mxu0 %v2097_v60  ;;  %v1026_v37 = vpack.i.b16 %v1025_v33, %v1024_v29  ;;  %v1125_v38 = vsel %vm1031_vm2, %v1023_v32, 0 }
 0x188   : > { %1964 = vmatpush3.bf16.msra.mxu1 %v1079_v35 }
 0x189   : > { %1960 = vmatmul.mubr.msk.bf16.vlgmr.msra.gmra.mxu0 %vm265_vm1, %v599_v36  ;;  %1975 = vmatprep.subr.bf16.mxu1 %v2097_v60  ;;  %v1171_v43 = vsel %vm1031_vm2, %v1026_v37, 0 }
 0x18a   : > { %1970 = vmatpush3.bf16.msra.mxu0 %v1125_v38  ;;  %1971 = vmatprep.mubr.msk.bf16.mxu0 %vm2098_vm0, %v2097_v60 }
 0x18b   : > { %1966 = vmatmul.mubr.msk.bf16.vlgmr.msra.gmra.mxu1 %vm265_vm1, %v602_v40  ;;  %1981 = vmatprep.subr.bf16.mxu0 %v2097_v60 }
 0x18c   : > { %1976 = vmatpush3.bf16.msra.mxu1 %v1171_v43  ;;  %1977 = vmatprep.mubr.msk.bf16.mxu1 %vm2098_vm0, %v2097_v60 }
 0x18d   : > { %1987 = vmatprep.subr.bf16.mxu1 %v2097_v60 }
 0x191   : > { %1972 = vmatmul.mubr.msk.bf16.vlgmr.msra.gmra.mxu0 %vm265_vm1, %v605_v46 }
 0x192   : > { %1983 = vmatprep.mubr.msk.bf16.mxu0 %vm2098_vm0, %v2097_v60 }
 0x193   : > { %1978 = vmatmul.mubr.msk.bf16.vlgmr.msra.gmra.mxu1 %vm265_vm1, %v608_v47 }
 0x194   : > { %1989 = vmatprep.mubr.msk.bf16.mxu1 %vm2098_vm0, %v2097_v60 }
 0x249   : > { %v1069_v39 = vpop.f32.mrf.mxu0 }
 0x24a   : > { %v2273_v50 = vsel %vm1223_vm4, %v1069_v39, -1e+30 }
 0x24b   : > { %v1961_v51 = vpop.f32.mrf.mxu0  ;;  %v1115_v52 = vpop.f32.mrf.mxu1  ;;  %v1234_v53 = vsel %vm265_vm1, %v2273_v50, -inf }
 0x24c   : > { %v2279_v54 = vsel %vm1223_vm4, %v1115_v52, -1e+30  ;;  %1235 = vmax.xlane.f32.xlu1 %v1234_v53 }
 0x24d   : > { %v1072_v55 = vpop.f32.mrf.mxu0  ;;  %v1967_v56 = vpop.f32.mrf.mxu1  ;;  %v1237_v3 = vsel %vm265_vm1, %v2279_v54, -inf }
 0x24e   : > { %1238 = vmax.xlane.f32.xlu0 %v1237_v3 }
 0x24f   : > { %v1962_v57 = vpop.f32.mrf.mxu0  ;;  %v1118_v58 = vpop.f32.mrf.mxu1 }
 0x251   : > { %v1968_v59 = vpop.f32.mrf.mxu1  ;;  %v1161_v61 = vpop.f32.mrf.mxu0 }
 0x252   : > { %v2285_v62 = vsel %vm1223_vm4, %v1161_v61, -1e+30 }
 0x253   : > { %v1973_v63 = vpop.f32.mrf.mxu0  ;;  %v1207_v0 = vpop.f32.mrf.mxu1  ;;  %v1240_v1 = vsel %vm265_vm1, %v2285_v62, -inf }
 0x254   : > { %v2291_v2 = vsel %vm1223_vm4, %v1207_v0, -1e+30  ;;  %1241 = vmax.xlane.f32.xlu1 %v1240_v1 }
 0x255   : > { %v1164_v4 = vpop.f32.mrf.mxu0  ;;  %v1979_v6 = vpop.f32.mrf.mxu1  ;;  %v1243_v7 = vsel %vm265_vm1, %v2291_v2, -inf }
 0x256   : > { %1244 = vmax.xlane.f32.xlu0 %v1243_v7 }
 0x257   : > { %v1974_v8 = vpop.f32.mrf.mxu0  ;;  %v1210_v9 = vpop.f32.mrf.mxu1 }
 0x259   : > { %v1980_v10 = vpop.f32.mrf.mxu1 }
 0x265   : > { %461 = vrot.lane.b32.xlu1 %v459_v11, %s2091_s20 }
 0x269   : > { %465 = vrot.lane.b32.xlu1 %v459_v11, %s2092_s21 }
 0x26c   : > { %463 = vrot.lane.b32.xlu0 %v459_v11, %s2093_s22 }
 0x2d5   : > { %v1236_v13 = vpop.xlane.xlu1 %1235 }
 0x2d6   : > { %v2307_v15 = vmax.f32 %v2302_v5, %v1236_v13 }
 0x2d7   : > { %v1239_v16 = vpop.xlane.xlu0 %1238 }
 0x2d8   : > { %v1250_v17 = vsub.f32 %v2302_v5, %v2307_v15  ;;  %1609 = vst.msk [vmem:[#allocation3] sm:$0xff] %vm270_vm3, %v2307_v15  ;;  %v2314_v18 = vmax.f32 %v2304_v14, %v1239_v16  ;;  %1264 = vperm.xlu1 %2041, %v2307_v15  }
 0x2da   : > { %v1251_v19 = vsub.f32 %v2304_v14, %v2314_v18  ;;  %1610 = vst.msk [vmem:[#allocation3 + $0x8] sm:$0xff] %vm270_vm3, %v2314_v18  ;;  %1269 = vperm.xlu0 %2042, %v2314_v18   ;;  %v1296_v18 = vld [vmem:[#allocation4 + $0x10] sm:$0xff] }
 0x2dd   : > { %v1242_v21 = vpop.xlane.xlu1 %1241 }
 0x2de   : > { %v2327_v24 = vmax.f32 %v2322_v20, %v1242_v21 }
 0x2df   : > { %v1245_v25 = vpop.xlane.xlu0 %1244 }
 0x2e0   : > { %v1252_v26 = vsub.f32 %v2322_v20, %v2327_v24  ;;  %1611 = vst.msk [vmem:[#allocation3 + $0x10] sm:$0xff] %vm270_vm3, %v2327_v24  ;;  %v2334_v27 = vmax.f32 %v2324_v22, %v1245_v25  ;;  %1274 = vperm.xlu1 %2041, %v2327_v24   ;;  %v1256_v20 = vmul.f32 1.442695, %v1251_v19 }
 0x2e1   : > { %v462_v29 = vpop.permute.xlu1 %461 }
 0x2e2   : > { %v1253_v30 = vsub.f32 %v2324_v22, %v2334_v27  ;;  %1612 = vst.msk [vmem:[#allocation3 + $0x18] sm:$0xff] %vm270_vm3, %v2334_v27  ;;  %v469_v31 = vpack.i.b16 %v462_v29, %v459_v11  ;;  %v471_v32 = vshrl.u32 %v462_v29, 16  ;;  %v1258_v5 = vmul.f32 1.442695, %v1252_v26 }
 0x2e3   : > { %v464_v33 = vpop.permute.xlu0 %463 }
 0x2e4   : > { %1279 = vperm.xlu1 %2041, %v2334_v27   ;;  %v472_v35 = vpack.i.b16 %v471_v32, %v470_v28  ;;  %v476_v36 = vshrl.u32 %v464_v33, 16  ;;  %v486_v38 = vrot.slane %v469_v31, %v2154_v12 }
 0x2e5   : > { %v466_v37 = vpop.permute.xlu1 %465 }
 0x2e6   : > { %v475_v40 = vpack.i.b16 %v466_v37, %v464_v33  ;;  %v477_v41 = vshrl.u32 %v466_v37, 16  ;;  %v520_v42 = vrot.slane %v472_v35, %v2154_v12 }
 0x2e8   : > { %v478_v43 = vpack.i.b16 %v477_v41, %v476_v36  ;;  %v494_v44 = vrot.slane %v475_v40, %v2154_v12 }
 0x2ea   : > { %v495_v45 = vcombine.low %v486_v38, %v494_v44  ;;  %v496_v46 = vcombine.high %v486_v38, %v494_v44  ;;  %v528_v47 = vrot.slane %v478_v43, %v2154_v12 }
 0x2ec   : > { %v503_v48 = vrot.slane %v495_v45, %v2159_v23  ;;  %v510_v49 = vrot.slane %v496_v46, %v2159_v23  ;;  %v529_v39 = vcombine.low %v520_v42, %v528_v47  ;;  %v530_v51 = vcombine.high %v520_v42, %v528_v47 }
 0x2ee   : > { %v537_v52 = vrot.slane %v529_v39, %v2159_v23  ;;  %v544_v53 = vrot.slane %v530_v51, %v2159_v23  ;;  %v1355_v55 = vcombine.low %v503_v48, %v510_v49  ;;  %v1931_v56 = vcombine.high %v503_v48, %v510_v49 }
 0x2ef   : > { %v1260_v51 = vmul.f32 1.442695, %v1253_v30  ;;  %v1294_v30 = vld [vmem:[#allocation4] sm:$0xff] }
 0x2f0   : > { %v1362_v3 = vrot.slane %v1355_v55, %v2154_v12  ;;  %v1370_v57 = vrot.slane %v1931_v56, %v2154_v12  ;;  %v1380_v58 = vcombine.low %v537_v52, %v544_v53  ;;  %v1932_v59 = vcombine.high %v537_v52, %v544_v53  ;;  %v1295_v55 = vld [vmem:[#allocation4 + $0x8] sm:$0xff] }
 0x2f2   : > { %v1387_v61 = vrot.slane %v1380_v58, %v2154_v12  ;;  %v1395_v63 = vrot.slane %v1932_v59, %v2154_v12  ;;  %v1371_v0 = vcombine.low %v1362_v3, %v1370_v57 }
 0x2f4   : > { %v1378_v1 = vrot.slane %v1371_v0, %v2159_v23  ;;  %v1396_v4 = vcombine.low %v1387_v61, %v1395_v63  ;;  %v1297_v63 = vld [vmem:[#allocation4 + $0x18] sm:$0xff] }
 0x2f6   : > { %v1403_v6 = vrot.slane %v1396_v4, %v2159_v23  ;;  %v1408_v7 = vshrl.u32 %v1378_v1, 16  ;;  %v1379_v8 = vcombine.high %v1378_v1, %v2096_v34 }
 0x2f8   : > { %v1407_v9 = vpack.i.b16 %v1403_v6, %v1378_v1  ;;  %v1409_v10 = vshrl.u32 %v1403_v6, 16  ;;  %v1404_v11 = vcombine.high %v1403_v6, %v2096_v34  ;;  %v1414_v13 = vshrl.u32 %v1379_v8, 16 }
 0x2fa   : > { %v1421_v16 = vsel %vm1031_vm2, %v1407_v9, 0  ;;  %v1410_v21 = vpack.i.b16 %v1409_v10, %v1408_v7  ;;  %v1413_v25 = vpack.i.b16 %v1404_v11, %v1379_v8  ;;  %v1415_v28 = vshrl.u32 %v1404_v11, 16 }
 0x2fb   : > { %1982 = vmatpush3.bf16.msra.mxu0 %v1421_v16 }
 0x2fc   : > { %v1467_v29 = vsel %vm1031_vm2, %v1410_v21, 0  ;;  %1993 = vmatprep.subr.bf16.mxu0 %v2097_v60  ;;  %v1416_v31 = vpack.i.b16 %v1415_v28, %v1414_v13  ;;  %v1323_v28 = vld [vmem:[#allocation2] sm:$0xff] }
 0x2fd   : > { %1988 = vmatpush3.bf16.msra.mxu1 %v1467_v29  ;;  %v1324_v29 = vld [vmem:[#allocation2 + $0x8] sm:$0xff] }
 0x2fe   : > { %1999 = vmatprep.subr.bf16.mxu1 %v2097_v60 }
 0x353   : > { %v1265_v32 = vpop.permute.xlu1 %1264 }
 0x354   : > { %v1282_v33 = vsub.f32 %v2273_v50, %v1265_v32 }
 0x355   : > { %v1270_v35 = vpop.permute.xlu0 %1269 }
 0x356   : > { %v1286_v34 = vmul.f32 1.442695, %v1282_v33  ;;  %v1283_v36 = vsub.f32 %v2279_v54, %v1270_v35  ;;  %v1254_v54 = vmul.f32 1.442695, %v1250_v17 }
 0x358   : > { %2043 = vpow2.f32 %v1286_v34  ;;  %v1288_v37 = vmul.f32 1.442695, %v1283_v36 }
 0x35a   : > { %2045 = vpow2.f32 %v1288_v37 }
 0x35b   : > { %v1275_v38 = vpop.permute.xlu1 %1274 }
 0x35c   : > { %v1284_v40 = vsub.f32 %v2285_v62, %v1275_v38  ;;  %v1513_v62 = vsel %vm1031_vm2, %v1413_v25, 0 }
 0x35e   : > { %v1290_v41 = vmul.f32 1.442695, %v1284_v40 }
 0x35f   : > { %v1280_v42 = vpop.permute.xlu1 %1279 }
 0x360   : > { %2047 = vpow2.f32 %v1290_v41  ;;  %v1285_v43 = vsub.f32 %v2291_v2, %v1280_v42  ;;  %v1559_v2 = vsel %vm1031_vm2, %v1416_v31, 0  ;;  %v1325_v41 = vld [vmem:[#allocation2 + $0x10] sm:$0xff] }
 0x362   : > { %v1292_v44 = vmul.f32 1.442695, %v1285_v43 }
 0x364   : > { %2049 = vpow2.f32 %v1292_v44 }
 0x365   : > { %v2044_v45 = vpop.eup %2043  ;;  %2051 = vpow2.f32 %v1254_v54 }
 0x366   : > { %v1302_v50 = vsel %vm265_vm1, %v2044_v45, 0.0  ;;  %v1351_v46 = vpack.c.bf16 %v2044_v45, %v2044_v45  ;;  %2053 = vpow2.f32 %v1258_v5 }
 0x367   : > { %v2046_v47 = vpop.eup %2045  ;;  %1303 = vadd.xlane.f32.xlu0 %v1302_v50  ;;  %2055 = vpow2.f32 %v1260_v51 }
 0x368   : > { %1984 = vmatmul.mubr.msk.bf16.vlgmr.msra.gmra.mxu0 %vm265_vm1, %v1351_v46  ;;  %v1305_v48 = vsel %vm265_vm1, %v2046_v47, 0.0  ;;  %v1352_v49 = vpack.c.bf16 %v2046_v47, %v2046_v47  ;;  %2057 = vpow2.f32 %v1256_v20  ;;  %v1326_v47 = vld [vmem:[#allocation2 + $0x18] sm:$0xff] }
 0x369   : > { %1994 = vmatpush3.bf16.msra.mxu0 %v1513_v62  ;;  %1306 = vadd.xlane.f32.xlu1 %v1305_v48 }
 0x36a   : > { %1990 = vmatmul.mubr.msk.bf16.vlgmr.msra.gmra.mxu1 %vm265_vm1, %v1352_v49  ;;  %1995 = vmatprep.mubr.msk.bf16.mxu0 %vm2098_vm0, %v2097_v60 }
 0x36b   : > { %2000 = vmatpush3.bf16.msra.mxu1 %v1559_v2  ;;  %2001 = vmatprep.mubr.msk.bf16.mxu1 %vm2098_vm0, %v2097_v60 }
 0x36d   : > { %v2048_v15 = vpop.eup %2047 }
 0x36e   : > { %v1308_v17 = vsel %vm265_vm1, %v2048_v15, 0.0  ;;  %v1353_v39 = vpack.c.bf16 %v2048_v15, %v2048_v15 }
 0x36f   : > { %1309 = vadd.xlane.f32.xlu0 %v1308_v17 }
 0x370   : > { %1996 = vmatmul.mubr.msk.bf16.vlgmr.msra.gmra.mxu0 %vm265_vm1, %v1353_v39 }
 0x371   : > { %v2050_v52 = vpop.eup %2049 }
 0x372   : > { %v1311_v60 = vsel %vm265_vm1, %v2050_v52, 0.0  ;;  %v1354_v53 = vpack.c.bf16 %v2050_v52, %v2050_v52  ;;  %v2052_v24 = vpop.eup %2051 }
 0x373   : > { %1312 = vadd.xlane.f32.xlu0 %v1311_v60  ;;  %v2054_v26 = vpop.eup %2053  ;;  %v1298_v56 = vmul.f32 %v2052_v24, %v1294_v30 }
 0x374   : > { %2002 = vmatmul.mubr.msk.bf16.vlgmr.msra.gmra.mxu1 %vm265_vm1, %v1354_v53  ;;  %v2056_v22 = vpop.eup %2055  ;;  %v1300_v19 = vmul.f32 %v2054_v26, %v1296_v18 }
 0x375   : > { %v2058_v27 = vpop.eup %2057  ;;  %v1301_v4 = vmul.f32 %v2056_v22, %v1297_v63 }
 0x376   : > { %v1299_v58 = vmul.f32 %v2058_v27, %v1295_v55 }
 0x37a   : > { %1329 = vperm.xlu1 %2041, %v2052_v24  }
 0x37e   : > { %1339 = vperm.xlu1 %2041, %v2054_v26  }
 0x382   : > { %1344 = vperm.xlu1 %2041, %v2056_v22  }
 0x389   : > { %1334 = vperm.xlu0 %2042, %v2058_v27  }
 0x3f0   : > { %v1304_v3 = vpop.xlane.xlu0 %1303 }
 0x3f1   : > { %v1314_v57 = vadd.f32 %v1304_v3, %v1298_v56 }
 0x3f2   : > { %v1307_v59 = vpop.xlane.xlu1 %1306 }
 0x3f3   : > { %1319 = vst.msk [vmem:[#allocation4] sm:$0xff] %vm270_vm3, %v1314_v57  ;;  %v1315_v14 = vadd.f32 %v1307_v59, %v1299_v58 }
 0x3f5   : > { %1320 = vst.msk [vmem:[#allocation4 + $0x8] sm:$0xff] %vm270_vm3, %v1315_v14 }
 0x3f6   : > { %v1330_v25 = vpop.permute.xlu1 %1329 }
 0x3f7   : > { %v1347_v32 = vmul.f32 %v1330_v25, %v1323_v28 }
 0x3f8   : > { %v1310_v61 = vpop.xlane.xlu0 %1309 }
 0x3f9   : > { %v1316_v0 = vadd.f32 %v1310_v61, %v1300_v19 }
 0x3fa   : > { %v1620_v1 = vld [vmem:[#allocation4] sm:$0xff]  ;;  %v1340_v35 = vpop.permute.xlu1 %1339 }
 0x3fb   : > { %1321 = vst.msk [vmem:[#allocation4 + $0x10] sm:$0xff] %vm270_vm3, %v1316_v0  ;;  %2059 = vrcp.f32 %v1620_v1  ;;  %v1349_v50 = vmul.f32 %v1340_v35, %v1325_v41 }
 0x3fc   : > { %v1313_v6 = vpop.xlane.xlu0 %1312  ;;  %v1621_v7 = vld [vmem:[#allocation4 + $0x8] sm:$0xff] }
 0x3fd   : > { %v1317_v8 = vadd.f32 %v1313_v6, %v1301_v4  ;;  %2061 = vrcp.f32 %v1621_v7 }
 0x3fe   : > { %v1345_v46 = vpop.permute.xlu1 %1344 }
 0x3ff   : > { %1322 = vst.msk [vmem:[#allocation4 + $0x18] sm:$0xff] %vm270_vm3, %v1317_v8  ;;  %v1350_v2 = vmul.f32 %v1345_v46, %v1326_v47 }
 0x402   : > { %v1622_v9 = vld [vmem:[#allocation4 + $0x10] sm:$0xff] }
 0x403   : > { %2063 = vrcp.f32 %v1622_v9 }
 0x404   : > { %v1335_v31 = vpop.permute.xlu0 %1334 }
 0x405   : > { %v1348_v34 = vmul.f32 %v1335_v31, %v1324_v29 }
 0x406   : > { %v1623_v10 = vld [vmem:[#allocation4 + $0x18] sm:$0xff] }
 0x407   : > { %2065 = vrcp.f32 %v1623_v10 }
 0x408   : > { %v2060_v11 = vpop.eup %2059 }
 0x409   : > { %1630 = vperm.xlu0 %2042, %v2060_v11  }
 0x40a   : > { %v2062_v13 = vpop.eup %2061 }
 0x40b   : > { %1635 = vperm.xlu1 %2041, %v2062_v13  }
 0x410   : > { %v2064_v16 = vpop.eup %2063 }
 0x411   : > { %1640 = vperm.xlu0 %2042, %v2064_v16  }
 0x414   : > { %v2066_v21 = vpop.eup %2065 }
 0x415   : > { %1645 = vperm.xlu1 %2041, %v2066_v21  }
 0x428   : > { %v1457_v33 = vpop.f32.mrf.mxu0 }
 0x429   : > { %v1601_v36 = vadd.f32 %v1457_v33, %v1347_v32 }
 0x42a   : > { %v1985_v37 = vpop.f32.mrf.mxu0  ;;  %v1503_v38 = vpop.f32.mrf.mxu1 }
 0x42b   : > { %1605 = vst.msk [vmem:[#allocation2] sm:$0xff] %vm265_vm1, %v1601_v36  ;;  %v1602_v40 = vadd.f32 %v1503_v38, %v1348_v34 }
 0x42c   : > { %v1460_v42 = vpop.f32.mrf.mxu0  ;;  %v1991_v43 = vpop.f32.mrf.mxu1 }
 0x42d   : > { %1606 = vst.msk [vmem:[#allocation2 + $0x8] sm:$0xff] %vm265_vm1, %v1602_v40 }
 0x42e   : > { %v1986_v44 = vpop.f32.mrf.mxu0  ;;  %v1506_v45 = vpop.f32.mrf.mxu1 }
 0x430   : > { %v1992_v54 = vpop.f32.mrf.mxu1  ;;  %v1549_v62 = vpop.f32.mrf.mxu0 }
 0x431   : > { %v1603_v48 = vadd.f32 %v1549_v62, %v1349_v50 }
 0x432   : > { %v1997_v49 = vpop.f32.mrf.mxu0  ;;  %v1616_v27 = vld [vmem:[#allocation2] sm:$0xff] }
 0x433   : > { %1607 = vst.msk [vmem:[#allocation2 + $0x10] sm:$0xff] %vm265_vm1, %v1603_v48 }
 0x434   : > { %v1552_v5 = vpop.f32.mrf.mxu0  ;;  %v1595_v15 = vpop.f32.mrf.mxu1  ;;  %v1617_v55 = vld [vmem:[#allocation2 + $0x8] sm:$0xff] }
 0x435   : > { %v1604_v17 = vadd.f32 %v1595_v15, %v1350_v2 }
 0x436   : > { %v1998_v39 = vpop.f32.mrf.mxu0  ;;  %v2003_v51 = vpop.f32.mrf.mxu1 }
 0x437   : > { %1608 = vst.msk [vmem:[#allocation2 + $0x18] sm:$0xff] %vm265_vm1, %v1604_v17 }
 0x438   : > { %v1598_v52 = vpop.f32.mrf.mxu1 }
 0x43a   : > { %v2004_v60 = vpop.f32.mrf.mxu1  ;;  %v1618_v26 = vld [vmem:[#allocation2 + $0x10] sm:$0xff] }
 0x43e   : > { %v1619_v56 = vld [vmem:[#allocation2 + $0x18] sm:$0xff] }
 0x484   : > { %v1631_v53 = vpop.permute.xlu0 %1630 }
 0x485   : > { %v1648_v30 = vmul.f32 %v1631_v53, %v1616_v27 }
 0x486   : > { %v1636_v20 = vpop.permute.xlu1 %1635 }
 0x487   : > { %v1649_v57 = vmul.f32 %v1636_v20, %v1617_v55 }
 0x48c   : > { %v1641_v24 = vpop.permute.xlu0 %1640 }
 0x48d   : > { %v1650_v22 = vmul.f32 %v1641_v24, %v1618_v26 }
 0x48f   : > { %v1652_v58 = vcombine.low %v1648_v30, %v1650_v22  ;;  %v1653_v59 = vcombine.high %v1648_v30, %v1650_v22 }
 0x490   : > { %v1646_v3 = vpop.permute.xlu1 %1645 }
 0x491   : > { %v1651_v14 = vmul.f32 %v1646_v3, %v1619_v56  ;;  %v1660_v61 = vrot.slane %v1652_v58, %v2154_v12  ;;  %v1667_v63 = vrot.slane %v1653_v59, %v2154_v12 }
 0x493   : > { %v1668_v18 = vcombine.low %v1649_v57, %v1651_v14  ;;  %v1669_v19 = vcombine.high %v1649_v57, %v1651_v14 }
 0x495   : > { %v1676_v0 = vrot.slane %v1668_v18, %v2154_v12  ;;  %v1683_v1 = vrot.slane %v1669_v19, %v2154_v12 }
 0x497   : > { %v1684_v4 = vcombine.low %v1660_v61, %v1676_v0  ;;  %v1685_v6 = vcombine.high %v1660_v61, %v1676_v0  ;;  %v1700_v7 = vcombine.low %v1667_v63, %v1683_v1  ;;  %v1701_v8 = vcombine.high %v1667_v63, %v1683_v1 }
 0x499   : > { %v1692_v9 = vrot.slane %v1684_v4, %v2159_v23  ;;  %v1699_v10 = vrot.slane %v1685_v6, %v2159_v23  ;;  %v1708_v11 = vrot.slane %v1700_v7, %v2159_v23  ;;  %v1715_v13 = vrot.slane %v1701_v8, %v2159_v23 }
 0x49b   : > { %v1720_v16 = vcombine.low %v1692_v9, %v1699_v10  ;;  %v1937_v21 = vcombine.high %v1692_v9, %v1699_v10  ;;  %v1736_v25 = vcombine.low %v1708_v11, %v1715_v13  ;;  %v1938_v28 = vcombine.high %v1708_v11, %v1715_v13 }
 0x49d   : > { %v1727_v29 = vrot.slane %v1720_v16, %v2154_v12  ;;  %v1735_v31 = vrot.slane %v1937_v21, %v2154_v12  ;;  %v1743_v32 = vrot.slane %v1736_v25, %v2154_v12  ;;  %v1751_v33 = vrot.slane %v1938_v28, %v2154_v12 }
 0x49f   : > { %v1753_v35 = vcombine.high %v1727_v29, %v1735_v31  ;;  %v1769_v34 = vcombine.high %v1743_v32, %v1751_v33  ;;  %v1752_v36 = vcombine.low %v1727_v29, %v1735_v31  ;;  %v1768_v37 = vcombine.low %v1743_v32, %v1751_v33 }
 0x4a1   : > { %v1767_v38 = vrot.slane %v1753_v35, %v2159_v23  ;;  %v1783_v40 = vrot.slane %v1769_v34, %v2159_v23  ;;  %v1760_v41 = vrot.slane %v1752_v36, %v2159_v23  ;;  %v1776_v42 = vrot.slane %v1768_v37, %v2159_v23 }
 0x4a3   : > { %v1786_v43 = vcombine.low %v1767_v38, %v1783_v40  ;;  %v1785_v44 = vcombine.high %v1760_v41, %v1776_v42  ;;  %v1784_v45 = vcombine.low %v1760_v41, %v1776_v42  ;;  %v1787_v12 = vcombine.high %v1767_v38, %v1783_v40 }
 0x4a5   : > { %1793 = vrot.lane.b32.xlu1 %v1786_v43, %s2100_s29  ;;  %1789 = vrot.lane.b32.xlu0 %v1785_v44, %s2101_s30 }
 0x4a9   : > { %1797 = vrot.lane.b32.xlu0 %v1787_v12, %s2102_s4 }
 0x517   : > { %v1790_v50 = vpop.permute.xlu0 %1789  ;;  %v1794_v46 = vpop.permute.xlu1 %1793 }
 0x518   : > { %v1801_v47 = vsel %vm265_vm1, %v1784_v45, %v1790_v50 }
 0x519   : > { %v1803_v62 = vsel %vm1802_vm5, %v1801_v47, %v1794_v46 }
 0x51b   : > { %v1798_v54 = vpop.permute.xlu0 %1797 }
 0x51c   : > { %v1805_v23 = vsel %vm1804_vm6, %v1803_v62, %v1798_v54 }
 0x51d   : > { %v1806_v48 = vpack.c.bf16 %v1805_v23, %v1805_v23 }
 0x51f   : > { %1808 = vst.msk [vmem:[%s259_s7] sm:$0xf] %vm1807_vm7, %v1806_v48 }
 0x520 PF: > { %s13_s14 = sadd.s32 1, %s2089_s14   ;;  %s2434_s12 = smov %s2085_s13 }
 0x521   : > { %p10_p5 = scmp.ge.s32.totalorder %s13_s14, 4   ;;  %s2435_s13 = smov %s2437_s15 }
 0x523   :  { %12 = sbr.rel (!%p10_p5) target bundleno = 2 (0x2), region = 80 }

</bundles_post_ra>
